<compile_context>
chip_gen: v7x
topology: tpu7x:2x2x1
jax: 0.10.0
libtpu: 0.0.40
codegen_flags: <defaults>
</compile_context>

<pallas_src>
import functools

import jax
import jax.numpy as jnp
from jax.experimental import pallas as pl
from jax.experimental.pallas import tpu as pltpu


def _round_up(n, m):
    return (n + m - 1) // m * m


# ----------------------------------------------------------------------------
# Fused Pallas kernel: whole network for B_TILE samples per grid step.
# ----------------------------------------------------------------------------
def _fused_posecnn_kernel(
    p_ref,      # (2*lp_pad, bt, 3)  f32 conv1 patches, time-major
    w1_ref,     # (3, 64)            bf16 conv1 weight (tap, out)
    b1_ref,     # (1, 64)            f32
    w2_ref,     # (3, 64, 128)       bf16 conv2 weight per tap (c_in, c_out)
    b2_ref,     # (1, 128)           f32
    wf1_ref,    # (l2*128, 512)      bf16 fused-K fc1 weight
    bf1_ref,    # (1, 512)           f32
    wf2_ref,    # (512, 128)         bf16 fc2 weight, lane-padded 2 -> 128
    bf2_ref,    # (1, 128)           f32 fc2 bias, lane-padded
    o_ref,      # (bt, 128)          f32 padded output rows for this tile
    *, lp_pad, l2, bt,
):
    f32, bf16 = jnp.float32, jnp.bfloat16

    # ---- conv1 + ReLU: one dot over all (pool-position x sample) rows -------
    p = p_ref[...].reshape(2 * lp_pad * bt, 3).astype(bf16)
    y = jnp.dot(p, w1_ref[...], preferred_element_type=f32)           # (M, 64)
    y = jnp.maximum(y + b1_ref[...], 0.0).reshape(2 * lp_pad, bt, 64)

    # ---- MaxPool(2,2): even rows in [0,lp_pad), odd rows in [lp_pad,2*lp_pad)
    pooled = jnp.maximum(y[:lp_pad], y[lp_pad:])                      # (lp_pad, bt, 64)
    # (pad time rows >= lp are garbage but are never read by conv2 below)

    # ---- conv2 + ReLU: 3 shifted, full-M, tile-aligned dots ------------------
    h2 = jnp.dot(pooled[0:l2].reshape(l2 * bt, 64).astype(bf16), w2_ref[0],
                 preferred_element_type=f32)
    for k in range(1, 3):
        h2 = h2 + jnp.dot(pooled[k:k + l2].reshape(l2 * bt, 64).astype(bf16),
                          w2_ref[k], preferred_element_type=f32)
    h2 = jnp.maximum(h2 + b2_ref[...], 0.0).reshape(l2, bt, 128)      # (l2, bt, 128)

    # ---- fc1 + ReLU: single fused-K dot (lane-concat of timestep slabs) -----
    lhs = jnp.concatenate([h2[t] for t in range(l2)], axis=-1)        # (bt, l2*128)
    h3 = jnp.dot(lhs.astype(bf16), wf1_ref[...], preferred_element_type=f32)
    h3 = jnp.maximum(h3 + bf1_ref[...], 0.0)                          # (bt, 512)

    # ---- fc2 (lane-padded N=128, unmasked store; sliced in wrapper) ---------
    out = jnp.dot(h3.astype(bf16), wf2_ref[...], preferred_element_type=f32)
    o_ref[...] = (out + bf2_ref[...]).astype(o_ref.dtype)


# ----------------------------------------------------------------------------
# Glue: conv1 im2col (tiny, input-only), parameter prep (run once)
# ----------------------------------------------------------------------------
def build_conv1_patches(x, lp, lp_pad):
    """x: (B_pad, L) f32 -> (2*lp_pad, B_pad, 3) f32, time-major.

    Time rows [0, lp) hold the even conv positions of each pooling window,
    rows [lp_pad, lp_pad+lp) the odd ones; pad rows are zero.
    """
    B, L = x.shape
    l1 = L - 2
    cols = jnp.stack([x[:, k:k + l1] for k in range(3)], axis=-1)  # (B, l1, 3)
    cols = cols[:, :2 * lp, :]                                     # drop pool tail
    pe = cols[:, 0::2, :]                                          # (B, lp, 3)
    po = cols[:, 1::2, :]                                          # (B, lp, 3)
    pad = [(0, 0), (0, lp_pad - lp), (0, 0)]
    patches = jnp.concatenate([jnp.pad(pe, pad), jnp.pad(po, pad)], axis=1)
    return jnp.transpose(patches, (1, 0, 2))                       # (2*lp_pad, B, 3)


def init_params(key, input_size):
    """Deterministic synthetic parameters, PyTorch layout conventions."""
    l1 = input_size - 2           # after conv1
    lp = l1 // 2                  # after pool
    lp_pad = _round_up(lp, 8)     # sublane-aligned half-length
    l2 = lp - 2                   # after conv2
    flat = 128 * l2
    ks = jax.random.split(key, 8)
    s = 0.1
    params = {
        "w1": jax.random.normal(ks[0], (64, 1, 3), jnp.float32) * s,    # Conv1d(1,64,3)
        "b1": jax.random.normal(ks[1], (64,), jnp.float32) * s,
        "w2": jax.random.normal(ks[2], (128, 64, 3), jnp.float32) * s,  # Conv1d(64,128,3)
        "b2": jax.random.normal(ks[3], (128,), jnp.float32) * s,
        "wf1": jax.random.normal(ks[4], (512, flat), jnp.float32) * s,  # Linear(flat,512)
        "bf1": jax.random.normal(ks[5], (512,), jnp.float32) * s,
        "wf2": jax.random.normal(ks[6], (2, 512), jnp.float32) * s,     # Linear(512,2)
        "bf2": jax.random.normal(ks[7], (2,), jnp.float32) * s,
    }
    return params, (l1, lp, lp_pad, l2, flat)


def prepare_params(params, dims):
    """All weight-layout work + bf16 casts, done ONCE (hoisted out of forward)."""
    l1, lp, lp_pad, l2, flat = dims
    bf16 = jnp.bfloat16
    # conv1: (64,1,3) -> (3,64): row k = tap, column o = out channel
    w1t = params["w1"].reshape(64, 3).T.astype(bf16)
    b1 = params["b1"].reshape(1, 64).astype(jnp.float32)
    # conv2: (128,64,3) -> per-tap (3,64,128): w2k[k, c, o] = w2[o, c, k]
    w2k = jnp.transpose(params["w2"], (2, 1, 0)).astype(bf16)
    b2 = params["b2"].reshape(1, 128).astype(jnp.float32)
    # fc1: PyTorch flattens (B,128,l2) channel-major (index c*l2+t). Fused-K
    # weight row t*128+c must therefore hold wf1[:, c*l2+t].
    wf1f = (params["wf1"].reshape(512, 128, l2).transpose(2, 1, 0)
            .reshape(l2 * 128, 512).astype(bf16))                      # (l2*128, 512)
    bf1 = params["bf1"].reshape(1, 512).astype(jnp.float32)
    # fc2: pad N=2 -> 128 for a lane-dense output store (sliced in wrapper)
    wf2p = jnp.zeros((512, 128), bf16).at[:, :2].set(params["wf2"].T.astype(bf16))
    bf2p = jnp.zeros((1, 128), jnp.float32).at[:, :2].set(params["bf2"][None, :])
    return dict(w1t=w1t, b1=b1, w2k=w2k, b2=b2, wf1f=wf1f, bf1=bf1,
                wf2p=wf2p, bf2p=bf2p)


# ----------------------------------------------------------------------------
# Forward pass: one fused pallas_call, grid over batch tiles (parallel on v7x)
# ----------------------------------------------------------------------------
def pose_cnn_forward(prep, x, dims):
    l1, lp, lp_pad, l2, flat = dims
    B, L = x.shape

    b_tile = min(128, _round_up(B, 8))       # samples per grid step (mult. of 8)
    b_pad = _round_up(B, b_tile)
    if b_pad != B:
        x = jnp.pad(x, [(0, b_pad - B), (0, 0)])

    patches = build_conv1_patches(x, lp, lp_pad)         # (2*lp_pad, b_pad, 3)

    kern = functools.partial(_fused_posecnn_kernel,
                             lp_pad=lp_pad, l2=l2, bt=b_tile)
    out_pad = pl.pallas_call(
        kern,
        out_shape=jax.ShapeDtypeStruct((b_pad, 128), jnp.float32),
        grid=(b_pad // b_tile,),
        in_specs=[
            pl.BlockSpec((2 * lp_pad, b_tile, 3), lambda i: (0, i, 0)),   # patches
            pl.BlockSpec((3, 64), lambda i: (0, 0)),                      # w1t
            pl.BlockSpec((1, 64), lambda i: (0, 0)),                      # b1
            pl.BlockSpec((3, 64, 128), lambda i: (0, 0, 0)),              # w2k
            pl.BlockSpec((1, 128), lambda i: (0, 0)),                     # b2
            pl.BlockSpec((l2 * 128, 512), lambda i: (0, 0)),              # wf1 fused-K
            pl.BlockSpec((1, 512), lambda i: (0, 0)),                     # bf1
            pl.BlockSpec((512, 128), lambda i: (0, 0)),                   # wf2 (padded)
            pl.BlockSpec((1, 128), lambda i: (0, 0)),                     # bf2 (padded)
        ],
        out_specs=pl.BlockSpec((b_tile, 128), lambda i: (i, 0)),
        compiler_params=pltpu.CompilerParams(
            dimension_semantics=("parallel",),
            vmem_limit_bytes=32 * 1024 * 1024),
    )(patches, prep["w1t"], prep["b1"], prep["w2k"], prep["b2"],
      prep["wf1f"], prep["bf1"], prep["wf2p"], prep["bf2p"])

    return out_pad[:B, :2]


# ----------------------------------------------------------------------------
# Pure-JAX f32 reference (same math, different codepath) for a sanity check
# ----------------------------------------------------------------------------
def pose_cnn_reference(params, x):
    B, L = x.shape
    x1 = x[:, None, :]                                               # (B,1,L)
    c1 = jnp.stack(
        [jnp.einsum("bcl,oc->bol", x1[:, :, k: L - 2 + k], params["w1"][:, :, k])
         for k in range(3)],
        axis=0,
    ).sum(0) + params["b1"][None, :, None]
    c1 = jax.nn.relu(c1)                                             # (B,64,L-2)
    lp = (L - 2) // 2
    pooled = jnp.maximum(c1[:, :, 0: 2 * lp: 2], c1[:, :, 1: 2 * lp: 2])
    Lp = pooled.shape[-1]
    c2 = jnp.stack(
        [jnp.einsum("bcl,oc->bol", pooled[:, :, k: Lp - 2 + k], params["w2"][:, :, k])
         for k in range(3)],
        axis=0,
    ).sum(0) + params["b2"][None, :, None]
    c2 = jax.nn.relu(c2)                                             # (B,128,Lp-2)
    flat = c2.reshape(B, -1)                                         # channel-major
    h = jax.nn.relu(flat @ params["wf1"].T + params["bf1"])
    return h @ params["wf2"].T + params["bf2"]


if __name__ == "__main__":
    B, INPUT_SIZE = 2, 16
    key = jax.random.PRNGKey(0)
    kx, kp = jax.random.split(key)
    x = jax.random.normal(kx, (B, INPUT_SIZE), jnp.float32)

    params, dims = init_params(kp, INPUT_SIZE)
    prep = prepare_params(params, dims)        # one-time weight layout + bf16 cast

    fwd = jax.jit(functools.partial(pose_cnn_forward, dims=dims))
    out = jax.block_until_ready(fwd(prep, x))

    ref = pose_cnn_reference(params, x)
    assert out.shape == (B, 2)
    # bf16 MXU operands (f32 accumulation) => loosened tolerance vs f32 reference.
    assert jnp.allclose(out, ref, atol=1e-1, rtol=1e-1), (out, ref)

    print("KERNEL_OK")
</pallas_src>

<mosaic_0001>
module attributes {stable_mosaic.version = 11 : i64} {
  func.func @_fused_posecnn_kernel(%arg0: i32, %arg1: memref<16x8x3xf32, #tpu.memory_space<vmem>>, %arg2: memref<3x64xbf16, #tpu.memory_space<vmem>>, %arg3: memref<1x64xf32, #tpu.memory_space<vmem>>, %arg4: memref<3x64x128xbf16, #tpu.memory_space<vmem>>, %arg5: memref<1x128xf32, #tpu.memory_space<vmem>>, %arg6: memref<640x512xbf16, #tpu.memory_space<vmem>>, %arg7: memref<1x512xf32, #tpu.memory_space<vmem>>, %arg8: memref<512x128xbf16, #tpu.memory_space<vmem>>, %arg9: memref<1x128xf32, #tpu.memory_space<vmem>>, %arg10: memref<8x128xf32, #tpu.memory_space<vmem>>) attributes {dimension_semantics = [#tpu.dimension_semantics<parallel>], iteration_bounds = array<i64: 1>, scalar_prefetch = 0 : i64, scratch_operands = 0 : i64, tpu.core_type = #tpu.core_type<tc>, window_params = [{transform_indices = @transform_0, window_bounds = array<i64: 16, 8, 3>}, {pipeline_mode = #tpu.pipeline_mode<synchronous>, transform_indices = @transform_1, window_bounds = array<i64: 3, 64>}, {pipeline_mode = #tpu.pipeline_mode<synchronous>, transform_indices = @transform_2, window_bounds = array<i64: 1, 64>}, {pipeline_mode = #tpu.pipeline_mode<synchronous>, transform_indices = @transform_3, window_bounds = array<i64: 3, 64, 128>}, {pipeline_mode = #tpu.pipeline_mode<synchronous>, transform_indices = @transform_4, window_bounds = array<i64: 1, 128>}, {pipeline_mode = #tpu.pipeline_mode<synchronous>, transform_indices = @transform_5, window_bounds = array<i64: 640, 512>}, {pipeline_mode = #tpu.pipeline_mode<synchronous>, transform_indices = @transform_6, window_bounds = array<i64: 1, 512>}, {pipeline_mode = #tpu.pipeline_mode<synchronous>, transform_indices = @transform_7, window_bounds = array<i64: 512, 128>}, {pipeline_mode = #tpu.pipeline_mode<synchronous>, transform_indices = @transform_8, window_bounds = array<i64: 1, 128>}, {transform_indices = @transform_9, window_bounds = array<i64: 8, 128>}]} {
    %c0 = arith.constant 0 : index
    %c0_0 = arith.constant 0 : index
    %c0_1 = arith.constant 0 : index
    %0 = vector.load %arg1[%c0, %c0_0, %c0_1] : memref<16x8x3xf32, #tpu.memory_space<vmem>>, vector<16x8x3xf32>
    %1 = vector.shape_cast %0 : vector<16x8x3xf32> to vector<128x3xf32>
    %2 = arith.truncf %1 : vector<128x3xf32> to vector<128x3xbf16>
    %c0_2 = arith.constant 0 : index
    %c0_3 = arith.constant 0 : index
    %3 = vector.load %arg2[%c0_2, %c0_3] : memref<3x64xbf16, #tpu.memory_space<vmem>>, vector<3x64xbf16>
    %cst = arith.constant dense<0.000000e+00> : vector<128x64xf32>
    %4 = tpu.matmul %2, %3, %cst {dimension_numbers = #tpu.dot_dimension_numbers<[1], [0], [0], [1], [0, 0, 1, 1], [], []>} : vector<128x3xbf16>, vector<3x64xbf16>, vector<128x64xf32> -> vector<128x64xf32>
    %c0_4 = arith.constant 0 : index
    %c0_5 = arith.constant 0 : index
    %5 = vector.load %arg3[%c0_4, %c0_5] : memref<1x64xf32, #tpu.memory_space<vmem>>, vector<1x64xf32>
    %6 = vector.broadcast %5 : vector<1x64xf32> to vector<128x64xf32>
    %7 = arith.addf %4, %6 : vector<128x64xf32>
    %cst_6 = arith.constant 0.000000e+00 : f32
    %8 = vector.broadcast %cst_6 : f32 to vector<128x64xf32>
    %9 = arith.maximumf %7, %8 : vector<128x64xf32>
    %10 = vector.shape_cast %9 : vector<128x64xf32> to vector<16x8x64xf32>
    %11 = vector.extract_strided_slice %10 {offsets = [0, 0, 0], sizes = [8, 8, 64], strides = [1, 1, 1]} : vector<16x8x64xf32> to vector<8x8x64xf32>
    %12 = vector.extract_strided_slice %10 {offsets = [8, 0, 0], sizes = [8, 8, 64], strides = [1, 1, 1]} : vector<16x8x64xf32> to vector<8x8x64xf32>
    %13 = arith.maximumf %11, %12 : vector<8x8x64xf32>
    %14 = vector.extract_strided_slice %13 {offsets = [0, 0, 0], sizes = [5, 8, 64], strides = [1, 1, 1]} : vector<8x8x64xf32> to vector<5x8x64xf32>
    %15 = vector.shape_cast %14 : vector<5x8x64xf32> to vector<40x64xf32>
    %16 = arith.truncf %15 : vector<40x64xf32> to vector<40x64xbf16>
    %c0_7 = arith.constant 0 : index
    %c0_8 = arith.constant 0 : index
    %c0_9 = arith.constant 0 : index
    %17 = vector.load %arg4[%c0_7, %c0_8, %c0_9] : memref<3x64x128xbf16, #tpu.memory_space<vmem>>, vector<1x64x128xbf16>
    %18 = vector.shape_cast %17 : vector<1x64x128xbf16> to vector<64x128xbf16>
    %cst_10 = arith.constant dense<0.000000e+00> : vector<40x128xf32>
    %19 = tpu.matmul %16, %18, %cst_10 {dimension_numbers = #tpu.dot_dimension_numbers<[1], [0], [0], [1], [0, 0, 1, 1], [], []>} : vector<40x64xbf16>, vector<64x128xbf16>, vector<40x128xf32> -> vector<40x128xf32>
    %20 = vector.extract_strided_slice %13 {offsets = [1, 0, 0], sizes = [5, 8, 64], strides = [1, 1, 1]} : vector<8x8x64xf32> to vector<5x8x64xf32>
    %21 = vector.shape_cast %20 : vector<5x8x64xf32> to vector<40x64xf32>
    %22 = arith.truncf %21 : vector<40x64xf32> to vector<40x64xbf16>
    %c1 = arith.constant 1 : index
    %c0_11 = arith.constant 0 : index
    %c0_12 = arith.constant 0 : index
    %23 = vector.load %arg4[%c1, %c0_11, %c0_12] : memref<3x64x128xbf16, #tpu.memory_space<vmem>>, vector<1x64x128xbf16>
    %24 = vector.shape_cast %23 : vector<1x64x128xbf16> to vector<64x128xbf16>
    %cst_13 = arith.constant dense<0.000000e+00> : vector<40x128xf32>
    %25 = tpu.matmul %22, %24, %cst_13 {dimension_numbers = #tpu.dot_dimension_numbers<[1], [0], [0], [1], [0, 0, 1, 1], [], []>} : vector<40x64xbf16>, vector<64x128xbf16>, vector<40x128xf32> -> vector<40x128xf32>
    %26 = arith.addf %19, %25 : vector<40x128xf32>
    %27 = vector.extract_strided_slice %13 {offsets = [2, 0, 0], sizes = [5, 8, 64], strides = [1, 1, 1]} : vector<8x8x64xf32> to vector<5x8x64xf32>
    %28 = vector.shape_cast %27 : vector<5x8x64xf32> to vector<40x64xf32>
    %29 = arith.truncf %28 : vector<40x64xf32> to vector<40x64xbf16>
    %c2 = arith.constant 2 : index
    %c0_14 = arith.constant 0 : index
    %c0_15 = arith.constant 0 : index
    %30 = vector.load %arg4[%c2, %c0_14, %c0_15] : memref<3x64x128xbf16, #tpu.memory_space<vmem>>, vector<1x64x128xbf16>
    %31 = vector.shape_cast %30 : vector<1x64x128xbf16> to vector<64x128xbf16>
    %cst_16 = arith.constant dense<0.000000e+00> : vector<40x128xf32>
    %32 = tpu.matmul %29, %31, %cst_16 {dimension_numbers = #tpu.dot_dimension_numbers<[1], [0], [0], [1], [0, 0, 1, 1], [], []>} : vector<40x64xbf16>, vector<64x128xbf16>, vector<40x128xf32> -> vector<40x128xf32>
    %33 = arith.addf %26, %32 : vector<40x128xf32>
    %c0_17 = arith.constant 0 : index
    %c0_18 = arith.constant 0 : index
    %34 = vector.load %arg5[%c0_17, %c0_18] : memref<1x128xf32, #tpu.memory_space<vmem>>, vector<1x128xf32>
    %35 = vector.broadcast %34 : vector<1x128xf32> to vector<40x128xf32>
    %36 = arith.addf %33, %35 : vector<40x128xf32>
    %cst_19 = arith.constant 0.000000e+00 : f32
    %37 = vector.broadcast %cst_19 : f32 to vector<40x128xf32>
    %38 = arith.maximumf %36, %37 : vector<40x128xf32>
    %39 = vector.shape_cast %38 : vector<40x128xf32> to vector<5x8x128xf32>
    %40 = vector.extract_strided_slice %39 {offsets = [0, 0, 0], sizes = [1, 8, 128], strides = [1, 1, 1]} : vector<5x8x128xf32> to vector<1x8x128xf32>
    %41 = vector.shape_cast %40 : vector<1x8x128xf32> to vector<8x128xf32>
    %42 = vector.extract_strided_slice %39 {offsets = [1, 0, 0], sizes = [1, 8, 128], strides = [1, 1, 1]} : vector<5x8x128xf32> to vector<1x8x128xf32>
    %43 = vector.shape_cast %42 : vector<1x8x128xf32> to vector<8x128xf32>
    %44 = vector.extract_strided_slice %39 {offsets = [2, 0, 0], sizes = [1, 8, 128], strides = [1, 1, 1]} : vector<5x8x128xf32> to vector<1x8x128xf32>
    %45 = vector.shape_cast %44 : vector<1x8x128xf32> to vector<8x128xf32>
    %46 = vector.extract_strided_slice %39 {offsets = [3, 0, 0], sizes = [1, 8, 128], strides = [1, 1, 1]} : vector<5x8x128xf32> to vector<1x8x128xf32>
    %47 = vector.shape_cast %46 : vector<1x8x128xf32> to vector<8x128xf32>
    %48 = vector.extract_strided_slice %39 {offsets = [4, 0, 0], sizes = [1, 8, 128], strides = [1, 1, 1]} : vector<5x8x128xf32> to vector<1x8x128xf32>
    %49 = vector.shape_cast %48 : vector<1x8x128xf32> to vector<8x128xf32>
    %50 = tpu.concatenate %41, %43, %45, %47, %49 in 1 : vector<8x128xf32>, vector<8x128xf32>, vector<8x128xf32>, vector<8x128xf32>, vector<8x128xf32> -> vector<8x640xf32>
    %51 = arith.truncf %50 : vector<8x640xf32> to vector<8x640xbf16>
    %c0_20 = arith.constant 0 : index
    %c0_21 = arith.constant 0 : index
    %52 = vector.load %arg6[%c0_20, %c0_21] : memref<640x512xbf16, #tpu.memory_space<vmem>>, vector<640x512xbf16>
    %cst_22 = arith.constant dense<0.000000e+00> : vector<8x512xf32>
    %53 = tpu.matmul %51, %52, %cst_22 {dimension_numbers = #tpu.dot_dimension_numbers<[1], [0], [0], [1], [0, 0, 1, 1], [], []>} : vector<8x640xbf16>, vector<640x512xbf16>, vector<8x512xf32> -> vector<8x512xf32>
    %c0_23 = arith.constant 0 : index
    %c0_24 = arith.constant 0 : index
    %54 = vector.load %arg7[%c0_23, %c0_24] : memref<1x512xf32, #tpu.memory_space<vmem>>, vector<1x512xf32>
    %55 = vector.broadcast %54 : vector<1x512xf32> to vector<8x512xf32>
    %56 = arith.addf %53, %55 : vector<8x512xf32>
    %cst_25 = arith.constant 0.000000e+00 : f32
    %57 = vector.broadcast %cst_25 : f32 to vector<8x512xf32>
    %58 = arith.maximumf %56, %57 : vector<8x512xf32>
    %59 = arith.truncf %58 : vector<8x512xf32> to vector<8x512xbf16>
    %c0_26 = arith.constant 0 : index
    %c0_27 = arith.constant 0 : index
    %60 = vector.load %arg8[%c0_26, %c0_27] : memref<512x128xbf16, #tpu.memory_space<vmem>>, vector<512x128xbf16>
    %cst_28 = arith.constant dense<0.000000e+00> : vector<8x128xf32>
    %61 = tpu.matmul %59, %60, %cst_28 {dimension_numbers = #tpu.dot_dimension_numbers<[1], [0], [0], [1], [0, 0, 1, 1], [], []>} : vector<8x512xbf16>, vector<512x128xbf16>, vector<8x128xf32> -> vector<8x128xf32>
    %c0_29 = arith.constant 0 : index
    %c0_30 = arith.constant 0 : index
    %62 = vector.load %arg9[%c0_29, %c0_30] : memref<1x128xf32, #tpu.memory_space<vmem>>, vector<1x128xf32>
    %63 = vector.broadcast %62 : vector<1x128xf32> to vector<8x128xf32>
    %64 = arith.addf %61, %63 : vector<8x128xf32>
    %c0_31 = arith.constant 0 : index
    %c0_32 = arith.constant 0 : index
    %65 = vector.load %arg10[%c0_31, %c0_32] : memref<8x128xf32, #tpu.memory_space<vmem>>, vector<8x128xf32>
    tpu.vector_store %arg10[%c0_31, %c0_32], %64 {strides = array<i32>} : memref<8x128xf32, #tpu.memory_space<vmem>>, vector<8x128xf32>,
    return
  }
  func.func @transform_0(%arg0: i32) -> (i32, i32, i32) {
    %c0_i32 = arith.constant 0 : i32
    %c0_i32_0 = arith.constant 0 : i32
    %c0_i32_1 = arith.constant 0 : i32
    return %c0_i32, %arg0, %c0_i32_0 : i32, i32, i32
  }
  func.func @transform_1(%arg0: i32) -> (i32, i32) {
    %c0_i32 = arith.constant 0 : i32
    %c0_i32_0 = arith.constant 0 : i32
    %c0_i32_1 = arith.constant 0 : i32
    return %c0_i32, %c0_i32_0 : i32, i32
  }
  func.func @transform_2(%arg0: i32) -> (i32, i32) {
    %c0_i32 = arith.constant 0 : i32
    %c0_i32_0 = arith.constant 0 : i32
    %c0_i32_1 = arith.constant 0 : i32
    return %c0_i32, %c0_i32_0 : i32, i32
  }
  func.func @transform_3(%arg0: i32) -> (i32, i32, i32) {
    %c0_i32 = arith.constant 0 : i32
    %c0_i32_0 = arith.constant 0 : i32
    %c0_i32_1 = arith.constant 0 : i32
    %c0_i32_2 = arith.constant 0 : i32
    return %c0_i32, %c0_i32_0, %c0_i32_1 : i32, i32, i32
  }
  func.func @transform_4(%arg0: i32) -> (i32, i32) {
    %c0_i32 = arith.constant 0 : i32
    %c0_i32_0 = arith.constant 0 : i32
    %c0_i32_1 = arith.constant 0 : i32
    return %c0_i32, %c0_i32_0 : i32, i32
  }
  func.func @transform_5(%arg0: i32) -> (i32, i32) {
    %c0_i32 = arith.constant 0 : i32
    %c0_i32_0 = arith.constant 0 : i32
    %c0_i32_1 = arith.constant 0 : i32
    return %c0_i32, %c0_i32_0 : i32, i32
  }
  func.func @transform_6(%arg0: i32) -> (i32, i32) {
    %c0_i32 = arith.constant 0 : i32
    %c0_i32_0 = arith.constant 0 : i32
    %c0_i32_1 = arith.constant 0 : i32
    return %c0_i32, %c0_i32_0 : i32, i32
  }
  func.func @transform_7(%arg0: i32) -> (i32, i32) {
    %c0_i32 = arith.constant 0 : i32
    %c0_i32_0 = arith.constant 0 : i32
    %c0_i32_1 = arith.constant 0 : i32
    return %c0_i32, %c0_i32_0 : i32, i32
  }
  func.func @transform_8(%arg0: i32) -> (i32, i32) {
    %c0_i32 = arith.constant 0 : i32
    %c0_i32_0 = arith.constant 0 : i32
    %c0_i32_1 = arith.constant 0 : i32
    return %c0_i32, %c0_i32_0 : i32, i32
  }
  func.func @transform_9(%arg0: i32) -> (i32, i32) {
    %c0_i32 = arith.constant 0 : i32
    %c0_i32_0 = arith.constant 0 : i32
    return %arg0, %c0_i32 : i32, i32
  }
}

</mosaic_0001>

<bundles_post_ra>
// kernel: pose_cnn_forward.1
= control target key start
LH: loop header
LB: loop body
LE: loop exit
PB: predicated region body
PF: predicated region fallthrough
CT: control target
= control target key end

     0   :  { %14 = vsyncpa [#allocation3], 0  ;;  %s2865_s30 = smov [#allocation2]   ;;  %s3199_s0 = inlined_call_operand.vmem [shape: f32[16,8,3], index: 0, kind: input, shape index: {}]   ;;  %s3200_s1 = inlined_call_operand.vmem [shape: bf16[3,64], index: 1, kind: input, shape index: {}]   ;;  %s3201_s2 = inlined_call_operand.vmem [shape: f32[1,64], index: 2, kind: input, shape index: {}]   ;;  %s3202_s3 = inlined_call_operand.vmem [shape: bf16[3,64,128], index: 3, kind: input, shape index: {}]   ;;  %s3203_s4 = inlined_call_operand.vmem [shape: f32[1,128], index: 4, kind: input, shape index: {}]   ;;  %s3204_s5 = inlined_call_operand.hbm [shape: bf16[640,512], index: 5, kind: input, shape index: {}]   ;;  %s3205_s6 = inlined_call_operand.vmem [shape: f32[1,512], index: 6, kind: input, shape index: {}]   ;;  %s3206_s7 = inlined_call_operand.vmem [shape: bf16[512,128], index: 7, kind: input, shape index: {}]   ;;  %s3207_s8 = inlined_call_operand.vmem [shape: f32[1,128], index: 8, kind: input, shape index: {}]   ;;  %s3208_s9 = inlined_call_operand.vmem [shape: f32[8,128], index: 9, kind: output, shape index: {}]  }
   0x1   :  { %s30_s10 = sshll.u32 %s2865_s30, 4  ;;  %s2841_s13 = scalar_lea.hbm %s3204_s5, 20480  ;;  %s31_s10 = int_to_ptr.vmem [resolvable:$true] %s30_s10 }
   0x2   :  { %p2842_p0 = scmp.ne.s32.totalorder %s3204_s5, %s2841_s13  ;;  %p2845_p1 = scmp.lt.u32.totalorder %s2841_s13, %s3204_s5 }
   0x4   :  { %p2847_p2 = pnand %p2845_p1, %p2842_p0 }
   0x6   :  { %2850 = shalt.err (!%p2847_p2)
}
   0x7   :  { %s2851_s18 = scalar_lea.vmem %s31_s10, 20480  ;;  %p2856_p4 = scmp.lt.s32.totalorder %s31_s10, %s31_s10 }
   0x8   :  { %p2852_p3 = scmp.ne.s32.totalorder %s31_s10, %s2851_s18  ;;  %p2857_p5 = scmp.lt.s32.totalorder %s2851_s18, %s2851_s18 }
   0xa   :  { %p2858_p6 = por %p2857_p5, %p2856_p4 }
   0xc   :  { %p2859_p7 = pnand %p2858_p6, %p2852_p3 }
   0xe   :  { %2862 = shalt.err (!%p2859_p7)
}
   0xf   :  { %s2866_s19 = smov 256   ;;  %s2867_s20 = smov 16  }
  0x10   :  { %36 = dma.hbm_to_vmem [thread:$0]  %s3204_s5, 20480, %s31_s10, [#allocation3], %s2866_s19, %s2866_s19, %s2867_s20  }
  0x11   :  { %2863 = dma.done.wait [#allocation3], 20480  }
  0x12   :  { %2864 = vsyncadd [#allocation3], 4294946816  ;;  %vm104_vm0 = vcmask 1040384   ;;  %vm105_vm1 = vcmask 1041408   ;;  %v2868_v0 = vmov 65535   ;;  %v47_v4 = vld [vmem:[%s3199_s0] sm:$0xff] }
  0x13   :  { %v106_v1 = vsel %vm104_vm0, 4294967295, %v2868_v0  ;;  %v71_v3 = vld [vmem:[%s3200_s1] sm:$0x3]  ;;  %v48_v5 = vld [vmem:[%s3199_s0 + $0x8] sm:$0xff]  ;;  %vm79_vm2 = vcmask 23552   ;;  %v49_v8 = vld [vmem:[%s3199_s0 + $0x10] sm:$0xff] }
  0x14   :  { %v107_v2 = vsel %vm105_vm1, %v106_v1, 0  ;;  %v63_v7 = vpack.c.bf16 %v48_v5, %v47_v4  ;;  %v50_v9 = vld [vmem:[%s3199_s0 + $0x18] sm:$0xff]  ;;  %v51_v10 = vld [vmem:[%s3199_s0 + $0x20] sm:$0xff]  ;;  %v52_v11 = vld [vmem:[%s3199_s0 + $0x28] sm:$0xff]  ;;  %v2869_v31 = vmov 0.0   ;;  %vm2870_vm3 = vmmov 0  }
  0x15   :  { %v109_v6 = vand.u32 %v107_v2, %v71_v3  ;;  %v64_v12 = vpack.c.bf16 %v50_v9, %v49_v8  ;;  %v65_v13 = vpack.c.bf16 %v52_v11, %v51_v10  ;;  %v53_v14 = vld [vmem:[%s3199_s0 + $0x30] sm:$0xff]  ;;  %v54_v15 = vld [vmem:[%s3199_s0 + $0x38] sm:$0xff]  ;;  %v55_v16 = vld [vmem:[%s3199_s0 + $0x40] sm:$0xff]  ;;  %2470 = vmatprep.subr.bf16.mxu1 %v2869_v31  ;;  %2478 = vmatprep.mubr.msk.bf16.mxu1 %vm2870_vm3, %v2869_v31  ;;  %vm274_vm4 = vcmask 523264  }
  0x16   :  { %2454 = vmatprep.mubr.msk.bf16.mxu0 %vm79_vm2, %v63_v7  ;;  %v56_v17 = vld [vmem:[%s3199_s0 + $0x48] sm:$0xff]  ;;  %v66_v18 = vpack.c.bf16 %v54_v15, %v53_v14  ;;  %v57_v20 = vld [vmem:[%s3199_s0 + $0x50] sm:$0xff]  ;;  %v58_v21 = vld [vmem:[%s3199_s0 + $0x58] sm:$0xff] }
  0x17   :  { %2452 = vmatprep.subr.bf16.mxu0 %v109_v6  ;;  %v67_v19 = vpack.c.bf16 %v56_v17, %v55_v16  ;;  %v59_v22 = vld [vmem:[%s3199_s0 + $0x60] sm:$0xff]  ;;  %v60_v23 = vld [vmem:[%s3199_s0 + $0x68] sm:$0xff]  ;;  %v68_v24 = vpack.c.bf16 %v58_v21, %v57_v20  ;;  %v61_v26 = vld [vmem:[%s3199_s0 + $0x70] sm:$0xff] }
  0x18   :  { %2453 = vmatpush3.bf16.msra.mxu0 %v109_v6  ;;  %v69_v25 = vpack.c.bf16 %v60_v23, %v59_v22  ;;  %v62_v27 = vld [vmem:[%s3199_s0 + $0x78] sm:$0xff]  ;;  %v2557_v29 = vld [vmem:[%s3202_s3 + $0x20] sm:$0xff]   ;;  %v2559_v32 = vld [vmem:[%s3202_s3 + $0x28] sm:$0xff]  }
  0x19   :  { %v70_v28 = vpack.c.bf16 %v62_v27, %v61_v26  ;;  %v2558_v30 = vld [vmem:[%s3202_s3] sm:$0xff]   ;;  %2490 = vmatprep.subr.bf16.mxu0 %v2869_v31  ;;  %2471 = vmatpush3.bf16.msra.mxu1 %v2557_v29  ;;  %v2560_v33 = vld [vmem:[%s3202_s3 + $0x8] sm:$0xff]   ;;  %v2561_v34 = vld [vmem:[%s3202_s3 + $0x30] sm:$0xff]  }
  0x1a   :  { %2472 = vmatprep.subr.bf16.mxu1 %v2869_v31  ;;  %v2562_v35 = vld [vmem:[%s3202_s3 + $0x10] sm:$0xff]   ;;  %v2563_v36 = vld [vmem:[%s3202_s3 + $0x38] sm:$0xff]   ;;  %v2138_v47 = vld [vmem:[%s3201_s2] ss:$0 sm:$0xff] }
  0x1b   :  { %2455 = vmatmul.mubr.msk.bf16.vlgmr.msra.gmra.mrb[0].mxu0 %vm79_vm2, %v64_v12  ;;  %v2564_v37 = vld [vmem:[%s3202_s3 + $0x18] sm:$0xff]   ;;  %v2571_v38 = vld [vmem:[#allocation2 + $0x4] ss:$16 sps:$4 sm:$0xff]   ;;  %v2569_v23 = vld [vmem:[#allocation2] ss:$16 sps:$4 sm:$0xff]  }
  0x1c   :  { %2458 = vmatprep.mubr.msk.bf16.mxu0 %vm79_vm2, %v65_v13  ;;  %2491 = vmatpush3.bf16.msra.mxu0 %v2558_v30  ;;  %v2565_v14 = vld [vmem:[%s3202_s3 + $0x40] sm:$0xff]   ;;  %v2566_v29 = vld [vmem:[%s3202_s3 + $0x48] sm:$0xff]  }
  0x1d   :  { %2492 = vmatprep.subr.bf16.mxu0 %v2869_v31  ;;  %2473 = vmatpush3.bf16.msra.mxu1 %v2559_v32  ;;  %v2577_v27 = vld [vmem:[#allocation2 + $0x24] ss:$16 sps:$4 sm:$0xff]  }
  0x1e   :  { %2474 = vmatprep.subr.bf16.mxu1 %v2869_v31 }
  0x20   :  { %2493 = vmatpush3.bf16.msra.mxu0 %v2560_v33 }
  0x21   :  { %2494 = vmatprep.subr.bf16.mxu0 %v2869_v31  ;;  %2475 = vmatpush3.bf16.msra.mxu1 %v2561_v34  ;;  %v2575_v34 = vld [vmem:[#allocation2 + $0x20] ss:$16 sps:$4 sm:$0xff]  }
  0x22   :  { %2476 = vmatprep.subr.bf16.mxu1 %v2869_v31 }
  0x23   :  { %2459 = vmatmul.mubr.msk.bf16.gmra.mrb[4].mxu0 %vm79_vm2, %v66_v18 }
  0x24   :  { %2462 = vmatprep.mubr.msk.bf16.mxu0 %vm79_vm2, %v67_v19  ;;  %2495 = vmatpush3.bf16.msra.mxu0 %v2562_v35 }
  0x25   :  { %2496 = vmatprep.subr.bf16.mxu0 %v2869_v31  ;;  %2477 = vmatpush3.bf16.msra.mxu1 %v2563_v36 }
  0x26   :  { %2510 = vmatprep.subr.bf16.mxu1 %v2869_v31 }
  0x28   :  { %2497 = vmatpush3.bf16.msra.mxu0 %v2564_v37  ;;  %v2567_v37 = vld [vmem:[%s3202_s3 + $0x50] sm:$0xff]  }
  0x29   :  { %1535 = vmatprep.subr.bf16.mxu0 %v2571_v38 }
  0x2b   :  { %2463 = vmatmul.mubr.msk.bf16.gmra.mrb[8].mxu0 %vm79_vm2, %v68_v24 }
  0x2c   :  { %2466 = vmatprep.mubr.msk.bf16.mxu0 %vm79_vm2, %v69_v25 }
  0x33   :  { %2467 = vmatmul.mubr.msk.bf16.gmra.mrb[12].mxu0 %vm79_vm2, %v70_v28 }
  0x34   :  { %2498 = vmatprep.mubr.msk.bf16.mxu0 %vm2870_vm3, %v2869_v31 }
  0xee   :  { %v2456_v39 = vpop.f32.mrb[0].mxu0 }
  0xef   :  { %v145_v40 = vpop.f32.mrb[1].mxu0  ;;  %v154_v48 = vadd.f32 %v2456_v39, %v2138_v47  ;;  %v2583_v39 = vld [vmem:[#allocation2 + $0x44] ss:$16 sps:$4 sm:$0xff]  }
  0xf0   :  { %v2457_v41 = vpop.f32.mrb[2].mxu0  ;;  %v146_v49 = vadd.f32 %v2138_v47, %v145_v40  ;;  %v2581_v40 = vld [vmem:[#allocation2 + $0x40] ss:$16 sps:$4 sm:$0xff]  }
  0xf1   :  { %v148_v42 = vpop.f32.mrb[3].mxu0  ;;  %v157_v51 = vadd.f32 %v2457_v41, %v2138_v47  ;;  %v208_v57 = vmax.f32 %v154_v48, 0.0  ;;  %v2568_v41 = vld [vmem:[%s3202_s3 + $0x58] sm:$0xff]   ;;  %v2593_v48 = vld [vmem:[#allocation2 + $0x80] ss:$16 sps:$4 sm:$0xff]  }
  0xf2   :  { %v149_v54 = vadd.f32 %v2138_v47, %v148_v42  ;;  %v206_v61 = vmax.f32 %v146_v49, 0.0  ;;  %v2589_v42 = vld [vmem:[#allocation2 + $0x64] ss:$16 sps:$4 sm:$0xff]  }
  0xf3   :  { %v209_v0 = vmax.f32 %v157_v51, 0.0  ;;  %v2601_v49 = vld [vmem:[#allocation2 + $0xa4] ss:$16 sps:$4 sm:$0xff]   ;;  %v2580_v51 = vld [vmem:[#allocation2 + $0x2c] ss:$16 sps:$4 sm:$0xff]  }
  0xf4   :  { %v207_v3 = vmax.f32 %v149_v54, 0.0  ;;  %v2578_v54 = vld [vmem:[#allocation2 + $0x28] ss:$16 sps:$4 sm:$0xff]  }
  0xf6   :  { %v2460_v43 = vpop.f32.mrb[4].mxu0 }
  0xf7   :  { %v161_v44 = vpop.f32.mrb[5].mxu0  ;;  %v170_v6 = vadd.f32 %v2460_v43, %v2138_v47  ;;  %v2574_v43 = vld [vmem:[#allocation2 + $0xc] ss:$16 sps:$4 sm:$0xff]  }
  0xf8   :  { %v2461_v45 = vpop.f32.mrb[6].mxu0  ;;  %v162_v8 = vadd.f32 %v2138_v47, %v161_v44  ;;  %v2587_v44 = vld [vmem:[#allocation2 + $0x60] ss:$16 sps:$4 sm:$0xff]  }
  0xf9   :  { %v164_v46 = vpop.f32.mrb[7].mxu0  ;;  %v212_v20 = vmax.f32 %v170_v6, 0.0  ;;  %v2619_v6 = vld [vmem:[#allocation2 + $0x104] ss:$16 sps:$4 sm:$0xff]  }
  0xfa   :  { %v165_v15 = vadd.f32 %v2138_v47, %v164_v46  ;;  %v210_v24 = vmax.f32 %v162_v8, 0.0  ;;  %v2617_v8 = vld [vmem:[#allocation2 + $0x100] ss:$16 sps:$4 sm:$0xff]  }
  0xfc   :  { %v211_v30 = vmax.f32 %v165_v15, 0.0  ;;  %v2634_v15 = vld [vmem:[#allocation2 + $0x14c] ss:$16 sps:$4 sm:$0xff]  }
  0xfe   :  { %v2464_v50 = vpop.f32.mrb[8].mxu0 }
  0xff   :  { %v185_v52 = vadd.f32 %v2464_v50, %v2138_v47  ;;  %v176_v53 = vpop.f32.mrb[9].mxu0  ;;  %v2572_v50 = vld [vmem:[#allocation2 + $0x8] ss:$16 sps:$4 sm:$0xff]  }
 0x100   :  { %v177_v55 = vadd.f32 %v2138_v47, %v176_v53  ;;  %v2465_v56 = vpop.f32.mrb[10].mxu0  ;;  %v2607_v53 = vld [vmem:[#allocation2 + $0xc4] ss:$16 sps:$4 sm:$0xff]  }
 0x101   :  { %v215_v58 = vmax.f32 %v185_v52, 0.0  ;;  %v188_v59 = vadd.f32 %v2465_v56, %v2138_v47  ;;  %v179_v60 = vpop.f32.mrb[11].mxu0  ;;  %v2599_v52 = vld [vmem:[#allocation2 + $0xa0] ss:$16 sps:$4 sm:$0xff]  }
 0x102   :  { %v213_v62 = vmax.f32 %v177_v55, 0.0  ;;  %v180_v63 = vadd.f32 %v2138_v47, %v179_v60  ;;  %v2586_v55 = vld [vmem:[#allocation2 + $0x4c] ss:$16 sps:$4 sm:$0xff]   ;;  %v2605_v56 = vld [vmem:[#allocation2 + $0xc0] ss:$16 sps:$4 sm:$0xff]  }
 0x103   :  { %v222_v1 = vmax.f32 %v208_v57, %v215_v58  ;;  %v216_v2 = vmax.f32 %v188_v59, 0.0  ;;  %v2613_v57 = vld [vmem:[#allocation2 + $0xe4] ss:$16 sps:$4 sm:$0xff]   ;;  %v2584_v58 = vld [vmem:[#allocation2 + $0x48] ss:$16 sps:$4 sm:$0xff]  }
 0x104   :  { %v220_v4 = vmax.f32 %v206_v61, %v213_v62  ;;  %v214_v5 = vmax.f32 %v180_v63, 0.0  ;;  %v2592_v59 = vld [vmem:[#allocation2 + $0x6c] ss:$16 sps:$4 sm:$0xff]   ;;  %v2611_v60 = vld [vmem:[#allocation2 + $0xe0] ss:$16 sps:$4 sm:$0xff]  }
 0x105   :  { %v223_v7 = vmax.f32 %v209_v0, %v216_v2  ;;  %v2590_v61 = vld [vmem:[#allocation2 + $0x68] ss:$16 sps:$4 sm:$0xff]   ;;  %v2598_v62 = vld [vmem:[#allocation2 + $0x8c] ss:$16 sps:$4 sm:$0xff]  }
 0x106   :  { %v221_v9 = vmax.f32 %v207_v3, %v214_v5  ;;  %v2468_v10 = vpop.f32.mrb[12].mxu0  ;;  %v2596_v63 = vld [vmem:[#allocation2 + $0x88] ss:$16 sps:$4 sm:$0xff]   ;;  %v2610_v3 = vld [vmem:[#allocation2 + $0xcc] ss:$16 sps:$4 sm:$0xff]  }
 0x107   :  { %v3033_v11 = vpack.c.bf16 %v223_v7, %v222_v1  ;;  %v201_v12 = vadd.f32 %v2468_v10, %v2138_v47  ;;  %v192_v13 = vpop.f32.mrb[13].mxu0  ;;  %v2602_v2 = vld [vmem:[#allocation2 + $0xa8] ss:$16 sps:$4 sm:$0xff]   ;;  %v2625_v10 = vld [vmem:[#allocation2 + $0x124] ss:$16 sps:$4 sm:$0xff]  }
 0x108   :  { %v227_v16 = vpack.c.bf16 %v221_v9, %v220_v4  ;;  %v238_v17 = vpack.c.bf16 %v222_v1, %v221_v9  ;;  %v193_v18 = vadd.f32 %v2138_v47, %v192_v13  ;;  %v2469_v19 = vpop.f32.mrb[14].mxu0  ;;  %v2604_v1 = vld [vmem:[#allocation2 + $0xac] ss:$16 sps:$4 sm:$0xff]   ;;  %v2614_v5 = vld [vmem:[#allocation2 + $0xe8] ss:$16 sps:$4 sm:$0xff]  }
 0x109   :  { %v219_v21 = vmax.f32 %v201_v12, 0.0  ;;  %v195_v22 = vpop.f32.mrb[15].mxu0  ;;  %v2616_v4 = vld [vmem:[#allocation2 + $0xec] ss:$16 sps:$4 sm:$0xff]   ;;  %v2620_v9 = vld [vmem:[#allocation2 + $0x108] ss:$16 sps:$4 sm:$0xff]  }
 0x10a   :  { %v217_v25 = vmax.f32 %v193_v18, 0.0  ;;  %v196_v26 = vadd.f32 %v2138_v47, %v195_v22  ;;  %2479 = vmatmul.mubr.msk.bf16.vlgmr.msra.gmra.mrb[0].mxu1 %vm274_vm4, %v238_v17  ;;  %2499 = vmatmul.mubr.msk.bf16.vlgmr.msra.gmra.mrb[16].mxu0 %vm274_vm4, %v227_v16  ;;  %v2595_v47 = vld [vmem:[#allocation2 + $0x84] ss:$16 sps:$4 sm:$0xff]   ;;  %v2626_v12 = vld [vmem:[#allocation2 + $0x128] ss:$16 sps:$4 sm:$0xff]  }
 0x10b   :  { %v3040_v28 = vmax.f32 %v212_v20, %v219_v21  ;;  %2511 = vmatpush3.bf16.msra.mxu1 %v2565_v14  ;;  %2482 = vmatprep.mubr.msk.bf16.mxu1 %vm2870_vm3, %v2869_v31  ;;  %v2628_v13 = vld [vmem:[#allocation2 + $0x12c] ss:$16 sps:$4 sm:$0xff]   ;;  %v2631_v14 = vld [vmem:[#allocation2 + $0x144] ss:$16 sps:$4 sm:$0xff]   ;;  %v2629_v16 = vld [vmem:[#allocation2 + $0x140] ss:$16 sps:$4 sm:$0xff]  }
 0x10c   :  { %v3047_v32 = vmax.f32 %v210_v24, %v217_v25  ;;  %v218_v33 = vmax.f32 %v196_v26, 0.0  ;;  %2512 = vmatprep.subr.bf16.mxu1 %v2869_v31  ;;  %2502 = vmatprep.mubr.msk.bf16.mxu0 %vm2870_vm3, %v2869_v31  ;;  %v2632_v17 = vld [vmem:[#allocation2 + $0x148] ss:$16 sps:$4 sm:$0xff]   ;;  %v2637_v18 = vld [vmem:[#allocation2 + $0x164] ss:$16 sps:$4 sm:$0xff]  }
 0x10d   :  { %1536 = vmatpush1.bf16.msra.mxu0 %v2569_v23  ;;  %v430_v0 = vpack.c.bf16 %v3040_v28, %v3040_v28  ;;  %v2635_v19 = vld [vmem:[#allocation2 + $0x160] ss:$16 sps:$4 sm:$0xff]   ;;  %v2638_v20 = vld [vmem:[#allocation2 + $0x168] ss:$16 sps:$4 sm:$0xff]   ;;  %v2640_v21 = vld [vmem:[#allocation2 + $0x16c] ss:$16 sps:$4 sm:$0xff]  }
 0x10e   :  { %v225_v35 = vmax.f32 %v211_v30, %v218_v33  ;;  %v239_v36 = vpack.c.bf16 %v3047_v32, %v223_v7  ;;  %1537 = vmatprep.subr.bf16.mxu0 %v2577_v27  ;;  %v229_v46 = vpack.c.bf16 %v3047_v32, %v3047_v32  ;;  %v2622_v7 = vld [vmem:[#allocation2 + $0x10c] ss:$16 sps:$4 sm:$0xff]   ;;  %v2643_v22 = vld [vmem:[#allocation2 + $0x184] ss:$16 sps:$4 sm:$0xff]   ;;  %v2641_v24 = vld [vmem:[#allocation2 + $0x180] ss:$16 sps:$4 sm:$0xff]  }
 0x10f   :  { %2513 = vmatpush3.bf16.msra.mxu1 %v2566_v29  ;;  %v2646_v23 = vld [vmem:[#allocation2 + $0x18c] ss:$16 sps:$4 sm:$0xff]   ;;  %v2644_v25 = vld [vmem:[#allocation2 + $0x188] ss:$16 sps:$4 sm:$0xff]   ;;  %v2649_v26 = vld [vmem:[#allocation2 + $0x1a4] ss:$16 sps:$4 sm:$0xff]  }
 0x110   :  { %v429_v38 = vpack.c.bf16 %v225_v35, %v3047_v32  ;;  %2514 = vmatprep.subr.bf16.mxu1 %v2869_v31  ;;  %v240_v45 = vpack.c.bf16 %v225_v35, %v225_v35  ;;  %v2647_v27 = vld [vmem:[#allocation2 + $0x1a0] ss:$16 sps:$4 sm:$0xff]   ;;  %v2650_v28 = vld [vmem:[#allocation2 + $0x1a8] ss:$16 sps:$4 sm:$0xff]   ;;  %v2652_v29 = vld [vmem:[#allocation2 + $0x1ac] ss:$16 sps:$4 sm:$0xff]  }
 0x111   :  { %1538 = vmatpush1.bf16.msra.mxu0 %v2575_v34  ;;  %v2655_v30 = vld [vmem:[#allocation2 + $0x1c4] ss:$16 sps:$4 sm:$0xff]   ;;  %v2658_v32 = vld [vmem:[#allocation2 + $0x1cc] ss:$16 sps:$4 sm:$0xff]   ;;  %v2653_v33 = vld [vmem:[#allocation2 + $0x1c0] ss:$16 sps:$4 sm:$0xff]  }
 0x112   :  { %2483 = vmatmul.mubr.msk.bf16.gmra.mrb[4].mxu1 %vm274_vm4, %v239_v36  ;;  %2503 = vmatmul.mubr.msk.bf16.gmra.mrb[20].mxu0 %vm274_vm4, %v3033_v11  ;;  %v2656_v34 = vld [vmem:[#allocation2 + $0x1c8] ss:$16 sps:$4 sm:$0xff]   ;;  %v2661_v35 = vld [vmem:[#allocation2 + $0x1e4] ss:$16 sps:$4 sm:$0xff]   ;;  %v2664_v36 = vld [vmem:[#allocation2 + $0x1ec] ss:$16 sps:$4 sm:$0xff]  }
 0x113   :  { %2515 = vmatpush3.bf16.msra.mxu1 %v2567_v37  ;;  %2486 = vmatprep.mubr.msk.bf16.mxu1 %vm2870_vm3, %v2869_v31  ;;  %v2659_v37 = vld [vmem:[#allocation2 + $0x1e0] ss:$16 sps:$4 sm:$0xff]  }
 0x114   :  { %2506 = vmatprep.mubr.msk.bf16.mxu0 %vm2870_vm3, %v2869_v31  ;;  %2516 = vmatprep.subr.bf16.mxu1 %v2869_v31 }
 0x115   :  { %1539 = vmatprep.subr.bf16.mxu0 %v2583_v39  ;;  %v2667_v39 = vld [vmem:[#allocation2 + $0x204] ss:$16 sps:$4 sm:$0xff]  }
 0x116   :  { %1540 = vmatpush1.bf16.msra.mxu0 %v2581_v40  ;;  %v2670_v40 = vld [vmem:[#allocation2 + $0x20c] ss:$16 sps:$4 sm:$0xff]  }
 0x117   :  { %2517 = vmatpush3.bf16.msra.mxu1 %v2568_v41  ;;  %1541 = vmatprep.subr.bf16.mxu0 %v2589_v42 }
 0x118   :  { %1658 = vmatprep.subr.bf16.mxu1 %v2574_v43 }
 0x11a   :  { %2487 = vmatmul.mubr.msk.bf16.gmra.mrb[8].mxu1 %vm274_vm4, %v240_v45  ;;  %2507 = vmatmul.mubr.msk.bf16.gmra.mrb[24].mxu0 %vm274_vm4, %v229_v46 }
 0x11b   :  { %2518 = vmatprep.mubr.msk.bf16.mxu1 %vm2870_vm3, %v2869_v31  ;;  %1542 = vmatpush1.bf16.msra.mxu0 %v2587_v44 }
 0x11c   :  { %1543 = vmatprep.subr.bf16.mxu0 %v2595_v47 }
 0x11f   :  { %1544 = vmatpush1.bf16.msra.mxu0 %v2593_v48 }
 0x120   :  { %1545 = vmatprep.subr.bf16.mxu0 %v2601_v49 }
 0x122   :  { %2519 = vmatmul.mubr.msk.bf16.vlgmr.msra.gmra.mrb[12].mxu1 %vm274_vm4, %v3033_v11  ;;  %v2623_v11 = vld [vmem:[#allocation2 + $0x120] ss:$16 sps:$4 sm:$0xff]  }
 0x123   :  { %2522 = vmatprep.mubr.msk.bf16.mxu1 %vm2870_vm3, %v2869_v31  ;;  %1659 = vmatpush1.bf16.msra.mxu1 %v2572_v50 }
 0x124   :  { %1660 = vmatprep.subr.bf16.mxu1 %v2580_v51  ;;  %1546 = vmatpush1.bf16.msra.mxu0 %v2599_v52 }
 0x125   :  { %1547 = vmatprep.subr.bf16.mxu0 %v2607_v53 }
 0x127   :  { %1661 = vmatpush1.bf16.msra.mxu1 %v2578_v54 }
 0x128   :  { %1662 = vmatprep.subr.bf16.mxu1 %v2586_v55  ;;  %1548 = vmatpush1.bf16.msra.mxu0 %v2605_v56 }
 0x129   :  { %1549 = vmatprep.subr.bf16.mxu0 %v2613_v57 }
 0x12a   :  { %2523 = vmatmul.mubr.msk.bf16.gmra.mrb[16].mxu1 %vm274_vm4, %v429_v38  ;;  %v2662_v38 = vld [vmem:[#allocation2 + $0x1e8] ss:$16 sps:$4 sm:$0xff]  }
 0x12b   :  { %2526 = vmatprep.mubr.msk.bf16.mxu1 %vm2870_vm3, %v2869_v31  ;;  %1663 = vmatpush1.bf16.msra.mxu1 %v2584_v58  ;;  %v2608_v31 = vld [vmem:[#allocation2 + $0xc8] ss:$16 sps:$4 sm:$0xff]  }
 0x12c   :  { %1664 = vmatprep.subr.bf16.mxu1 %v2592_v59  ;;  %1550 = vmatpush1.bf16.msra.mxu0 %v2611_v60 }
 0x12d   :  { %1551 = vmatprep.subr.bf16.mxu0 %v2619_v6  ;;  %v2184_v6 = vld [vmem:[%s3203_s4] ss:$0 sm:$0xff] }
 0x12f   :  { %1665 = vmatpush1.bf16.msra.mxu1 %v2590_v61 }
 0x130   :  { %1666 = vmatprep.subr.bf16.mxu1 %v2598_v62  ;;  %1552 = vmatpush1.bf16.msra.mxu0 %v2617_v8 }
 0x131   :  { %1553 = vmatprep.subr.bf16.mxu0 %v2625_v10 }
 0x132   :  { %2527 = vmatmul.mubr.msk.bf16.gmra.mrb[20].mxu1 %vm274_vm4, %v430_v0 }
 0x133   :  { %1667 = vmatpush1.bf16.msra.mxu1 %v2596_v63 }
 0x134   :  { %1668 = vmatprep.subr.bf16.mxu1 %v2604_v1  ;;  %1554 = vmatpush1.bf16.msra.mxu0 %v2623_v11 }
 0x135   :  { %1555 = vmatprep.subr.bf16.mxu0 %v2631_v14 }
 0x137   :  { %1669 = vmatpush1.bf16.msra.mxu1 %v2602_v2 }
 0x138   :  { %1670 = vmatprep.subr.bf16.mxu1 %v2610_v3  ;;  %1556 = vmatpush1.bf16.msra.mxu0 %v2629_v16 }
 0x139   :  { %1557 = vmatprep.subr.bf16.mxu0 %v2637_v18 }
 0x13b   :  { %1671 = vmatpush1.bf16.msra.mxu1 %v2608_v31 }
 0x13c   :  { %1672 = vmatprep.subr.bf16.mxu1 %v2616_v4  ;;  %1558 = vmatpush1.bf16.msra.mxu0 %v2635_v19 }
 0x13d   :  { %1559 = vmatprep.subr.bf16.mxu0 %v2643_v22 }
 0x13f   :  { %1673 = vmatpush1.bf16.msra.mxu1 %v2614_v5 }
 0x140   :  { %1674 = vmatprep.subr.bf16.mxu1 %v2622_v7  ;;  %1560 = vmatpush1.bf16.msra.mxu0 %v2641_v24  ;;  %v2673_v24 = vld [vmem:[#allocation2 + $0x224] ss:$16 sps:$4 sm:$0xff]  }
 0x141   :  { %1561 = vmatprep.subr.bf16.mxu0 %v2649_v26 }
 0x143   :  { %1675 = vmatpush1.bf16.msra.mxu1 %v2620_v9 }
 0x144   :  { %1676 = vmatprep.subr.bf16.mxu1 %v2628_v13  ;;  %1562 = vmatpush1.bf16.msra.mxu0 %v2647_v27 }
 0x145   :  { %1563 = vmatprep.subr.bf16.mxu0 %v2655_v30  ;;  %v2671_v30 = vld [vmem:[#allocation2 + $0x220] ss:$16 sps:$4 sm:$0xff]  }
 0x147   :  { %1677 = vmatpush1.bf16.msra.mxu1 %v2626_v12 }
 0x148   :  { %1678 = vmatprep.subr.bf16.mxu1 %v2634_v15  ;;  %1564 = vmatpush1.bf16.msra.mxu0 %v2653_v33  ;;  %v2679_v33 = vld [vmem:[#allocation2 + $0x244] ss:$16 sps:$4 sm:$0xff]  }
 0x149   :  { %1565 = vmatprep.subr.bf16.mxu0 %v2661_v35 }
 0x14b   :  { %1679 = vmatpush1.bf16.msra.mxu1 %v2632_v17 }
 0x14c   :  { %1680 = vmatprep.subr.bf16.mxu1 %v2640_v21  ;;  %1566 = vmatpush1.bf16.msra.mxu0 %v2659_v37  ;;  %v2668_v21 = vld [vmem:[#allocation2 + $0x208] ss:$16 sps:$4 sm:$0xff]  }
 0x14d   :  { %1576 = vmatprep.subr.bf16.mxu0 %v2667_v39 }
 0x14f   :  { %1681 = vmatpush1.bf16.msra.mxu1 %v2638_v20  ;;  %v2665_v20 = vld [vmem:[#allocation2 + $0x200] ss:$16 sps:$4 sm:$0xff]  }
 0x150   :  { %1682 = vmatprep.subr.bf16.mxu1 %v2646_v23 }
 0x153   :  { %1683 = vmatpush1.bf16.msra.mxu1 %v2644_v25  ;;  %v2676_v25 = vld [vmem:[#allocation2 + $0x22c] ss:$16 sps:$4 sm:$0xff]  }
 0x154   :  { %1684 = vmatprep.subr.bf16.mxu1 %v2652_v29 }
 0x157   :  { %1685 = vmatpush1.bf16.msra.mxu1 %v2650_v28 }
 0x158   :  { %1686 = vmatprep.subr.bf16.mxu1 %v2658_v32  ;;  %v2674_v32 = vld [vmem:[#allocation2 + $0x228] ss:$16 sps:$4 sm:$0xff]  }
 0x15b   :  { %1687 = vmatpush1.bf16.msra.mxu1 %v2656_v34  ;;  %v2682_v34 = vld [vmem:[#allocation2 + $0x24c] ss:$16 sps:$4 sm:$0xff]  }
 0x15c   :  { %1688 = vmatprep.subr.bf16.mxu1 %v2664_v36 }
 0x15f   :  { %1689 = vmatpush1.bf16.msra.mxu1 %v2662_v38 }
 0x160   :  { %1699 = vmatprep.subr.bf16.mxu1 %v2670_v40  ;;  %v2677_v40 = vld [vmem:[#allocation2 + $0x240] ss:$16 sps:$4 sm:$0xff]  }
 0x1dd   :  { %v318_v41 = vpop.f32.mrb[0].mxu1  ;;  %v407_v42 = vpop.f32.mrb[16].mxu0 }
 0x1de   :  { %v408_v43 = vadd.f32 %v407_v42, %v318_v41  ;;  %v2480_v44 = vpop.f32.mrb[1].mxu1  ;;  %v2500_v45 = vpop.f32.mrb[17].mxu0  ;;  %v2680_v41 = vld [vmem:[#allocation2 + $0x248] ss:$16 sps:$4 sm:$0xff]  }
 0x1df   :  { %v321_v46 = vpop.f32.mrb[2].mxu1  ;;  %v410_v47 = vpop.f32.mrb[18].mxu0  ;;  %v2688_v44 = vld [vmem:[#allocation2 + $0x26c] ss:$16 sps:$4 sm:$0xff]  }
 0x1e0   :  { %v411_v48 = vadd.f32 %v410_v47, %v321_v46  ;;  %v2481_v49 = vpop.f32.mrb[3].mxu1  ;;  %v2501_v50 = vpop.f32.mrb[19].mxu0  ;;  %v2683_v47 = vld [vmem:[#allocation2 + $0x260] ss:$16 sps:$4 sm:$0xff]  }
 0x1e1   :  { %v2691_v49 = vld [vmem:[#allocation2 + $0x284] ss:$16 sps:$4 sm:$0xff]   ;;  %v2694_v50 = vld [vmem:[#allocation2 + $0x28c] ss:$16 sps:$4 sm:$0xff]  }
 0x1e5   :  { %v326_v51 = vpop.f32.mrb[4].mxu1  ;;  %v415_v52 = vpop.f32.mrb[20].mxu0 }
 0x1e6   :  { %v416_v53 = vadd.f32 %v415_v52, %v326_v51  ;;  %v2484_v54 = vpop.f32.mrb[5].mxu1  ;;  %v2504_v55 = vpop.f32.mrb[21].mxu0  ;;  %v2689_v51 = vld [vmem:[#allocation2 + $0x280] ss:$16 sps:$4 sm:$0xff]   ;;  %v2692_v52 = vld [vmem:[#allocation2 + $0x288] ss:$16 sps:$4 sm:$0xff]  }
 0x1e7   :  { %v329_v56 = vpop.f32.mrb[6].mxu1  ;;  %v418_v57 = vpop.f32.mrb[22].mxu0  ;;  %v2700_v54 = vld [vmem:[#allocation2 + $0x2ac] ss:$16 sps:$4 sm:$0xff]   ;;  %v2695_v55 = vld [vmem:[#allocation2 + $0x2a0] ss:$16 sps:$4 sm:$0xff]  }
 0x1e8   :  { %v419_v58 = vadd.f32 %v418_v57, %v329_v56  ;;  %v2485_v59 = vpop.f32.mrb[7].mxu1  ;;  %v2505_v60 = vpop.f32.mrb[23].mxu0  ;;  %v2698_v56 = vld [vmem:[#allocation2 + $0x2a8] ss:$16 sps:$4 sm:$0xff]   ;;  %v2703_v57 = vld [vmem:[#allocation2 + $0x2c4] ss:$16 sps:$4 sm:$0xff]  }
 0x1e9   :  { %v2701_v59 = vld [vmem:[#allocation2 + $0x2c0] ss:$16 sps:$4 sm:$0xff]   ;;  %v2704_v60 = vld [vmem:[#allocation2 + $0x2c8] ss:$16 sps:$4 sm:$0xff]  }
 0x1ed   :  { %v334_v61 = vpop.f32.mrb[8].mxu1  ;;  %v423_v62 = vpop.f32.mrb[24].mxu0 }
 0x1ee   :  { %v424_v63 = vadd.f32 %v423_v62, %v334_v61  ;;  %v2488_v0 = vpop.f32.mrb[9].mxu1  ;;  %v2508_v1 = vpop.f32.mrb[25].mxu0  ;;  %v2709_v61 = vld [vmem:[#allocation2 + $0x2e4] ss:$16 sps:$4 sm:$0xff]   ;;  %v2712_v62 = vld [vmem:[#allocation2 + $0x2ec] ss:$16 sps:$4 sm:$0xff]  }
 0x1ef   :  { %v337_v2 = vpop.f32.mrb[10].mxu1  ;;  %v426_v3 = vpop.f32.mrb[26].mxu0  ;;  %v2710_v0 = vld [vmem:[#allocation2 + $0x2e8] ss:$16 sps:$4 sm:$0xff]   ;;  %v2715_v1 = vld [vmem:[#allocation2 + $0x304] ss:$16 sps:$4 sm:$0xff]  }
 0x1f0   :  { %v2489_v31 = vpop.f32.mrb[11].mxu1  ;;  %v2509_v4 = vpop.f32.mrb[27].mxu0  ;;  %v2718_v2 = vld [vmem:[#allocation2 + $0x30c] ss:$16 sps:$4 sm:$0xff]   ;;  %v2713_v3 = vld [vmem:[#allocation2 + $0x300] ss:$16 sps:$4 sm:$0xff]  }
 0x1f1   :  { %v2716_v31 = vld [vmem:[#allocation2 + $0x308] ss:$16 sps:$4 sm:$0xff]   ;;  %v2721_v4 = vld [vmem:[#allocation2 + $0x324] ss:$16 sps:$4 sm:$0xff]  }
 0x1f5   :  { %v504_v5 = vpop.f32.mrb[12].mxu1 }
 0x1f6   :  { %v526_v7 = vadd.f32 %v504_v5, %v408_v43  ;;  %v2520_v8 = vpop.f32.mrb[13].mxu1  ;;  %v2685_v43 = vld [vmem:[#allocation2 + $0x264] ss:$16 sps:$4 sm:$0xff]   ;;  %v2724_v5 = vld [vmem:[#allocation2 + $0x32c] ss:$16 sps:$4 sm:$0xff]  }
 0x1f7   :  { %v507_v9 = vpop.f32.mrb[14].mxu1  ;;  %v2727_v8 = vld [vmem:[#allocation2 + $0x344] ss:$16 sps:$4 sm:$0xff]  }
 0x1f8   :  { %v538_v10 = vadd.f32 %v2184_v6, %v526_v7  ;;  %v527_v11 = vadd.f32 %v507_v9, %v411_v48  ;;  %v2521_v12 = vpop.f32.mrb[15].mxu1  ;;  %v2686_v48 = vld [vmem:[#allocation2 + $0x268] ss:$16 sps:$4 sm:$0xff]   ;;  %v2730_v9 = vld [vmem:[#allocation2 + $0x34c] ss:$16 sps:$4 sm:$0xff]  }
 0x1f9   :  { %v2722_v7 = vld [vmem:[#allocation2 + $0x328] ss:$16 sps:$4 sm:$0xff]   ;;  %v2733_v12 = vld [vmem:[#allocation2 + $0x364] ss:$16 sps:$4 sm:$0xff]  }
 0x1fa   :  { %v539_v13 = vadd.f32 %v2184_v6, %v527_v11  ;;  %v543_v14 = vmax.f32 %v538_v10, 0.0  ;;  %v2725_v10 = vld [vmem:[#allocation2 + $0x340] ss:$16 sps:$4 sm:$0xff]   ;;  %v2728_v11 = vld [vmem:[#allocation2 + $0x348] ss:$16 sps:$4 sm:$0xff]  }
 0x1fc   :  { %v544_v15 = vmax.f32 %v539_v13, 0.0  ;;  %v548_v22 = vpack.c.bf16 %v543_v14, %v543_v14  ;;  %v2736_v13 = vld [vmem:[#allocation2 + $0x36c] ss:$16 sps:$4 sm:$0xff]   ;;  %v2731_v14 = vld [vmem:[#allocation2 + $0x360] ss:$16 sps:$4 sm:$0xff]  }
 0x1fd   :  { %v512_v16 = vpop.f32.mrb[16].mxu1 }
 0x1fe   :  { %v549_v17 = vpack.c.bf16 %v544_v15, %v544_v15  ;;  %v528_v18 = vadd.f32 %v512_v16, %v416_v53  ;;  %v2524_v19 = vpop.f32.mrb[17].mxu1  ;;  %v2697_v53 = vld [vmem:[#allocation2 + $0x2a4] ss:$16 sps:$4 sm:$0xff]   ;;  %v2734_v15 = vld [vmem:[#allocation2 + $0x368] ss:$16 sps:$4 sm:$0xff]  }
 0x1ff   :  { %v515_v23 = vpop.f32.mrb[18].mxu1  ;;  %v2739_v16 = vld [vmem:[#allocation2 + $0x384] ss:$16 sps:$4 sm:$0xff]   ;;  %v2740_v19 = vld [vmem:[#allocation2 + $0x388] ss:$16 sps:$4 sm:$0xff]  }
 0x200   :  { %v3088_v26 = vadd.f32 %v2184_v6, %v528_v18  ;;  %v529_v27 = vadd.f32 %v515_v23, %v419_v58  ;;  %v2525_v28 = vpop.f32.mrb[19].mxu1  ;;  %1567 = vmatprep.mubr.bf16.mxu0 %v549_v17  ;;  %1690 = vmatprep.mubr.bf16.mxu1 %v549_v17  ;;  %v2706_v58 = vld [vmem:[#allocation2 + $0x2cc] ss:$16 sps:$4 sm:$0xff]   ;;  %v2737_v18 = vld [vmem:[#allocation2 + $0x380] ss:$16 sps:$4 sm:$0xff]  }
 0x201   :  { %1568 = vmatmul.mubr.bf16.vlgmr.msra.gmra.mrb[28].mxu0 %v548_v22  ;;  %1691 = vmatmul.mubr.bf16.vlgmr.msra.gmra.mrb[24].mxu1 %v548_v22  ;;  %v2742_v17 = vld [vmem:[#allocation2 + $0x38c] ss:$16 sps:$4 sm:$0xff]   ;;  %v2743_v22 = vld [vmem:[#allocation2 + $0x3a0] ss:$16 sps:$4 sm:$0xff]   ;;  %v2746_v23 = vld [vmem:[#allocation2 + $0x3a8] ss:$16 sps:$4 sm:$0xff]  }
 0x202   :  { %v541_v29 = vadd.f32 %v2184_v6, %v529_v27  ;;  %1577 = vmatpush1.bf16.msra.mxu0 %v2665_v20  ;;  %1700 = vmatpush1.bf16.msra.mxu1 %v2668_v21  ;;  %v2745_v20 = vld [vmem:[#allocation2 + $0x3a4] ss:$16 sps:$4 sm:$0xff]   ;;  %v2748_v21 = vld [vmem:[#allocation2 + $0x3ac] ss:$16 sps:$4 sm:$0xff]   ;;  %v2749_v27 = vld [vmem:[#allocation2 + $0x3c0] ss:$16 sps:$4 sm:$0xff]  }
 0x203   :  { %1578 = vmatprep.subr.bf16.mxu0 %v2673_v24  ;;  %1701 = vmatprep.subr.bf16.mxu1 %v2676_v25  ;;  %v2751_v24 = vld [vmem:[#allocation2 + $0x3c4] ss:$16 sps:$4 sm:$0xff]   ;;  %v2754_v25 = vld [vmem:[#allocation2 + $0x3cc] ss:$16 sps:$4 sm:$0xff]   ;;  %v2752_v28 = vld [vmem:[#allocation2 + $0x3c8] ss:$16 sps:$4 sm:$0xff]  }
 0x204   :  { %v546_v35 = vmax.f32 %v541_v29, 0.0  ;;  %v2757_v29 = vld [vmem:[#allocation2 + $0x3e4] ss:$16 sps:$4 sm:$0xff]  }
 0x205   :  { %v520_v36 = vpop.f32.mrb[20].mxu1 }
 0x206   :  { %v551_v37 = vpack.c.bf16 %v546_v35, %v546_v35  ;;  %v530_v38 = vadd.f32 %v520_v36, %v424_v63  ;;  %1579 = vmatpush1.bf16.msra.mxu0 %v2671_v30  ;;  %1702 = vmatpush1.bf16.msra.mxu1 %v2674_v32  ;;  %v2528_v39 = vpop.f32.mrb[21].mxu1  ;;  %v2707_v63 = vld [vmem:[#allocation2 + $0x2e0] ss:$16 sps:$4 sm:$0xff]   ;;  %v2760_v30 = vld [vmem:[#allocation2 + $0x3ec] ss:$16 sps:$4 sm:$0xff]  }
 0x207   :  { %v523_v42 = vpop.f32.mrb[22].mxu1  ;;  %1580 = vmatprep.subr.bf16.mxu0 %v2679_v33  ;;  %1703 = vmatprep.subr.bf16.mxu1 %v2682_v34  ;;  %v2755_v32 = vld [vmem:[#allocation2 + $0x3e0] ss:$16 sps:$4 sm:$0xff]   ;;  %v2758_v33 = vld [vmem:[#allocation2 + $0x3e8] ss:$16 sps:$4 sm:$0xff]   ;;  %v545_v34 = vmax.f32 %v3088_v26, 0.0 }
 0x208   :  { %v3090_v45 = vadd.f32 %v2184_v6, %v530_v38  ;;  %v2529_v46 = vpop.f32.mrb[23].mxu1  ;;  %1608 = vmatprep.mubr.bf16.mxu0 %v551_v37  ;;  %1731 = vmatprep.mubr.bf16.mxu1 %v551_v37  ;;  %v2719_v6 = vld [vmem:[#allocation2 + $0x320] ss:$16 sps:$4 sm:$0xff]   ;;  %v2763_v35 = vld [vmem:[#allocation2 + $0x404] ss:$16 sps:$4 sm:$0xff]  }
 0x209   :  { %v2766_v36 = vld [vmem:[#allocation2 + $0x40c] ss:$16 sps:$4 sm:$0xff]   ;;  %v2761_v37 = vld [vmem:[#allocation2 + $0x400] ss:$16 sps:$4 sm:$0xff]   ;;  %v2764_v38 = vld [vmem:[#allocation2 + $0x408] ss:$16 sps:$4 sm:$0xff]   ;;  %v550_v39 = vpack.c.bf16 %v545_v34, %v545_v34 }
 0x20a   :  { %1581 = vmatpush1.bf16.msra.mxu0 %v2677_v40  ;;  %1704 = vmatpush1.bf16.msra.mxu1 %v2680_v41  ;;  %v2769_v40 = vld [vmem:[#allocation2 + $0x424] ss:$16 sps:$4 sm:$0xff]   ;;  %v2772_v41 = vld [vmem:[#allocation2 + $0x42c] ss:$16 sps:$4 sm:$0xff]   ;;  %v2767_v42 = vld [vmem:[#allocation2 + $0x420] ss:$16 sps:$4 sm:$0xff]  }
 0x20b   :  { %1582 = vmatprep.subr.bf16.mxu0 %v2685_v43  ;;  %1705 = vmatprep.subr.bf16.mxu1 %v2688_v44  ;;  %v2770_v43 = vld [vmem:[#allocation2 + $0x428] ss:$16 sps:$4 sm:$0xff]   ;;  %v2775_v26 = vld [vmem:[#allocation2 + $0x444] ss:$16 sps:$4 sm:$0xff]   ;;  %v2778_v44 = vld [vmem:[#allocation2 + $0x44c] ss:$16 sps:$4 sm:$0xff]  }
 0x20c   :  { %v2871_v46 = vmov 0   ;;  %v2836_v34 = vld [vmem:[%s3206_s7 + $0xb0] sm:$0xff]  }
 0x20e   :  { %1583 = vmatpush1.bf16.msra.mxu0 %v2683_v47  ;;  %1706 = vmatpush1.bf16.msra.mxu1 %v2686_v48  ;;  %v2773_v47 = vld [vmem:[#allocation2 + $0x440] ss:$16 sps:$4 sm:$0xff]   ;;  %v2776_v48 = vld [vmem:[#allocation2 + $0x448] ss:$16 sps:$4 sm:$0xff]  }
 0x20f   :  { %1584 = vmatprep.subr.bf16.mxu0 %v2691_v49  ;;  %1707 = vmatprep.subr.bf16.mxu1 %v2694_v50  ;;  %v2781_v49 = vld [vmem:[#allocation2 + $0x464] ss:$16 sps:$4 sm:$0xff]   ;;  %v2784_v50 = vld [vmem:[#allocation2 + $0x46c] ss:$16 sps:$4 sm:$0xff]  }
 0x212   :  { %1585 = vmatpush1.bf16.msra.mxu0 %v2689_v51  ;;  %1708 = vmatpush1.bf16.msra.mxu1 %v2692_v52  ;;  %v2779_v51 = vld [vmem:[#allocation2 + $0x460] ss:$16 sps:$4 sm:$0xff]   ;;  %v2782_v52 = vld [vmem:[#allocation2 + $0x468] ss:$16 sps:$4 sm:$0xff]  }
 0x213   :  { %1586 = vmatprep.subr.bf16.mxu0 %v2697_v53  ;;  %1709 = vmatprep.subr.bf16.mxu1 %v2700_v54  ;;  %v2787_v53 = vld [vmem:[#allocation2 + $0x484] ss:$16 sps:$4 sm:$0xff]   ;;  %v2790_v54 = vld [vmem:[#allocation2 + $0x48c] ss:$16 sps:$4 sm:$0xff]  }
 0x216   :  { %1587 = vmatpush1.bf16.msra.mxu0 %v2695_v55  ;;  %1710 = vmatpush1.bf16.msra.mxu1 %v2698_v56  ;;  %v2785_v55 = vld [vmem:[#allocation2 + $0x480] ss:$16 sps:$4 sm:$0xff]   ;;  %v2788_v56 = vld [vmem:[#allocation2 + $0x488] ss:$16 sps:$4 sm:$0xff]  }
 0x217   :  { %1588 = vmatprep.subr.bf16.mxu0 %v2703_v57  ;;  %1711 = vmatprep.subr.bf16.mxu1 %v2706_v58  ;;  %v2793_v57 = vld [vmem:[#allocation2 + $0x4a4] ss:$16 sps:$4 sm:$0xff]   ;;  %v2796_v58 = vld [vmem:[#allocation2 + $0x4ac] ss:$16 sps:$4 sm:$0xff]  }
 0x21a   :  { %1589 = vmatpush1.bf16.msra.mxu0 %v2701_v59  ;;  %1712 = vmatpush1.bf16.msra.mxu1 %v2704_v60  ;;  %v2791_v59 = vld [vmem:[#allocation2 + $0x4a0] ss:$16 sps:$4 sm:$0xff]   ;;  %v2794_v60 = vld [vmem:[#allocation2 + $0x4a8] ss:$16 sps:$4 sm:$0xff]  }
 0x21b   :  { %1590 = vmatprep.subr.bf16.mxu0 %v2709_v61  ;;  %1713 = vmatprep.subr.bf16.mxu1 %v2712_v62  ;;  %v2799_v61 = vld [vmem:[#allocation2 + $0x4c4] ss:$16 sps:$4 sm:$0xff]   ;;  %v2802_v62 = vld [vmem:[#allocation2 + $0x4cc] ss:$16 sps:$4 sm:$0xff]  }
 0x21e   :  { %1591 = vmatpush1.bf16.msra.mxu0 %v2707_v63  ;;  %1714 = vmatpush1.bf16.msra.mxu1 %v2710_v0  ;;  %v2797_v63 = vld [vmem:[#allocation2 + $0x4c0] ss:$16 sps:$4 sm:$0xff]   ;;  %v2800_v0 = vld [vmem:[#allocation2 + $0x4c8] ss:$16 sps:$4 sm:$0xff]  }
 0x21f   :  { %1592 = vmatprep.subr.bf16.mxu0 %v2715_v1  ;;  %1715 = vmatprep.subr.bf16.mxu1 %v2718_v2  ;;  %v2805_v1 = vld [vmem:[#allocation2 + $0x4e4] ss:$16 sps:$4 sm:$0xff]   ;;  %v2808_v2 = vld [vmem:[#allocation2 + $0x4ec] ss:$16 sps:$4 sm:$0xff]  }
 0x222   :  { %1593 = vmatpush1.bf16.msra.mxu0 %v2713_v3  ;;  %1716 = vmatpush1.bf16.msra.mxu1 %v2716_v31  ;;  %v2803_v3 = vld [vmem:[#allocation2 + $0x4e0] ss:$16 sps:$4 sm:$0xff]   ;;  %v2806_v31 = vld [vmem:[#allocation2 + $0x4e8] ss:$16 sps:$4 sm:$0xff]  }
 0x223   :  { %1594 = vmatprep.subr.bf16.mxu0 %v2721_v4  ;;  %1717 = vmatprep.subr.bf16.mxu1 %v2724_v5  ;;  %v547_v4 = vmax.f32 %v3090_v45, 0.0  ;;  %v2809_v5 = vld [vmem:[%s3206_s7 + $0x40] sm:$0xff]  }
 0x224   :  { %v2812_v45 = vld [vmem:[%s3206_s7 + $0x80] sm:$0xff]  }
 0x226   :  { %1595 = vmatpush1.bf16.msra.mxu0 %v2719_v6  ;;  %1718 = vmatpush1.bf16.msra.mxu1 %v2722_v7  ;;  %v2810_v6 = vld [vmem:[%s3206_s7 + $0xc0] sm:$0xff]  }
 0x227   :  { %1596 = vmatprep.subr.bf16.mxu0 %v2727_v8  ;;  %1719 = vmatprep.subr.bf16.mxu1 %v2730_v9  ;;  %v2811_v7 = vld [vmem:[%s3206_s7] sm:$0xff]   ;;  %v552_v8 = vpack.c.bf16 %v547_v4, %v547_v4  ;;  %v2813_v9 = vld [vmem:[%s3206_s7 + $0x48] sm:$0xff]  }
 0x22a   :  { %1597 = vmatpush1.bf16.msra.mxu0 %v2725_v10  ;;  %1720 = vmatpush1.bf16.msra.mxu1 %v2728_v11  ;;  %v2814_v10 = vld [vmem:[%s3206_s7 + $0xc8] sm:$0xff]  }
 0x22b   :  { %1598 = vmatprep.subr.bf16.mxu0 %v2733_v12  ;;  %1721 = vmatprep.subr.bf16.mxu1 %v2736_v13  ;;  %v2815_v11 = vld [vmem:[%s3206_s7 + $0x8] sm:$0xff]   ;;  %v2817_v13 = vld [vmem:[%s3206_s7 + $0x50] sm:$0xff]  }
 0x22c   :  { %v2816_v12 = vld [vmem:[%s3206_s7 + $0x88] sm:$0xff]  }
 0x22e   :  { %1599 = vmatpush1.bf16.msra.mxu0 %v2731_v14  ;;  %1722 = vmatpush1.bf16.msra.mxu1 %v2734_v15  ;;  %v2818_v14 = vld [vmem:[%s3206_s7 + $0xd0] sm:$0xff]  }
 0x22f   :  { %1600 = vmatprep.subr.bf16.mxu0 %v2739_v16  ;;  %1723 = vmatprep.subr.bf16.mxu1 %v2742_v17  ;;  %v2819_v15 = vld [vmem:[%s3206_s7 + $0x10] sm:$0xff]   ;;  %v2821_v17 = vld [vmem:[%s3206_s7 + $0x58] sm:$0xff]  }
 0x230   :  { %v2820_v16 = vld [vmem:[%s3206_s7 + $0x90] sm:$0xff]  }
 0x232   :  { %1601 = vmatpush1.bf16.msra.mxu0 %v2737_v18  ;;  %1724 = vmatpush1.bf16.msra.mxu1 %v2740_v19  ;;  %v2822_v18 = vld [vmem:[%s3206_s7 + $0xd8] sm:$0xff]  }
 0x233   :  { %1602 = vmatprep.subr.bf16.mxu0 %v2745_v20  ;;  %1725 = vmatprep.subr.bf16.mxu1 %v2748_v21  ;;  %v2823_v19 = vld [vmem:[%s3206_s7 + $0x18] sm:$0xff]   ;;  %v2825_v21 = vld [vmem:[%s3206_s7 + $0x60] sm:$0xff]  }
 0x234   :  { %v2824_v20 = vld [vmem:[%s3206_s7 + $0x98] sm:$0xff]  }
 0x236   :  { %1603 = vmatpush1.bf16.msra.mxu0 %v2743_v22  ;;  %1726 = vmatpush1.bf16.msra.mxu1 %v2746_v23  ;;  %v2826_v22 = vld [vmem:[%s3206_s7 + $0xe0] sm:$0xff]  }
 0x237   :  { %1604 = vmatprep.subr.bf16.mxu0 %v2751_v24  ;;  %1727 = vmatprep.subr.bf16.mxu1 %v2754_v25  ;;  %v2827_v23 = vld [vmem:[%s3206_s7 + $0x20] sm:$0xff]   ;;  %v2829_v25 = vld [vmem:[%s3206_s7 + $0x68] sm:$0xff]  }
 0x238   :  { %v2828_v24 = vld [vmem:[%s3206_s7 + $0xa0] sm:$0xff]  }
 0x23a   :  { %1605 = vmatpush1.bf16.msra.mxu0 %v2749_v27  ;;  %1728 = vmatpush1.bf16.msra.mxu1 %v2752_v28  ;;  %v2830_v27 = vld [vmem:[%s3206_s7 + $0xe8] sm:$0xff]  }
 0x23b   :  { %1606 = vmatprep.subr.bf16.mxu0 %v2757_v29  ;;  %1729 = vmatprep.subr.bf16.mxu1 %v2760_v30  ;;  %v2831_v28 = vld [vmem:[%s3206_s7 + $0x28] sm:$0xff]   ;;  %v2833_v30 = vld [vmem:[%s3206_s7 + $0x70] sm:$0xff]  }
 0x23c   :  { %v2832_v29 = vld [vmem:[%s3206_s7 + $0xa8] sm:$0xff]  }
 0x23e   :  { %1607 = vmatpush1.bf16.msra.mxu0 %v2755_v32  ;;  %1730 = vmatpush1.bf16.msra.mxu1 %v2758_v33  ;;  %v2834_v32 = vld [vmem:[%s3206_s7 + $0xf0] sm:$0xff]  }
 0x23f   :  { %1617 = vmatprep.subr.bf16.mxu0 %v2763_v35  ;;  %1740 = vmatprep.subr.bf16.mxu1 %v2766_v36  ;;  %v2835_v33 = vld [vmem:[%s3206_s7 + $0x30] sm:$0xff]   ;;  %v2837_v35 = vld [vmem:[%s3206_s7 + $0x78] sm:$0xff]  }
 0x240   :  { %v2838_v36 = vld [vmem:[%s3206_s7 + $0xf8] sm:$0xff]  }
 0x241   :  { %1609 = vmatmul.mubr.bf16.vlgmr.msra.gmra.mrb[28].mxu0 %v550_v39  ;;  %1732 = vmatmul.mubr.bf16.vlgmr.msra.gmra.mrb[24].mxu1 %v550_v39  ;;  %v715_v39 = vlaneseq }
 0x242   :  { %1618 = vmatpush1.bf16.msra.mxu0 %v2761_v37  ;;  %1741 = vmatpush1.bf16.msra.mxu1 %v2764_v38  ;;  %v2839_v37 = vld [vmem:[%s3206_s7 + $0x38] sm:$0xff]  }
 0x243   :  { %1619 = vmatprep.subr.bf16.mxu0 %v2769_v40  ;;  %1742 = vmatprep.subr.bf16.mxu1 %v2772_v41  ;;  %v2840_v38 = vld [vmem:[%s3206_s7 + $0xb8] sm:$0xff]   ;;  %v716_v40 = vshrl.u32 %v715_v39, 7 }
 0x244   :  { %1649 = vmatprep.mubr.bf16.mxu0 %v2871_v46  ;;  %1772 = vmatprep.mubr.bf16.mxu1 %v2871_v46 }
 0x245   :  { %v717_v41 = vsub.s32 0, %v716_v40 }
 0x246   :  { %1620 = vmatpush1.bf16.msra.mxu0 %v2767_v42  ;;  %1743 = vmatpush1.bf16.msra.mxu1 %v2770_v43  ;;  %v725_v42 = vsub.s32 2, %v716_v40  ;;  %v713_v43 = vld [vmem:[%s3205_s6] sm:$0xf] }
 0x247   :  { %1621 = vmatprep.subr.bf16.mxu0 %v2775_v26  ;;  %1744 = vmatprep.subr.bf16.mxu1 %v2778_v44  ;;  %v721_v26 = vsub.s32 1, %v716_v40  ;;  %v729_v44 = vsub.s32 3, %v716_v40  ;;  %v718_v46 = vrot.slane %v713_v43, %v717_v41 }
 0x24a   :  { %1622 = vmatpush1.bf16.msra.mxu0 %v2773_v47  ;;  %1745 = vmatpush1.bf16.msra.mxu1 %v2776_v48  ;;  %v726_v47 = vrot.slane %v713_v43, %v725_v42  ;;  %v722_v48 = vrot.slane %v713_v43, %v721_v26 }
 0x24b   :  { %1623 = vmatprep.subr.bf16.mxu0 %v2781_v49  ;;  %1746 = vmatprep.subr.bf16.mxu1 %v2784_v50  ;;  %v730_v49 = vrot.slane %v713_v43, %v729_v44 }
 0x24e   :  { %1624 = vmatpush1.bf16.msra.mxu0 %v2779_v51  ;;  %1747 = vmatpush1.bf16.msra.mxu1 %v2782_v52 }
 0x24f   :  { %1625 = vmatprep.subr.bf16.mxu0 %v2787_v53  ;;  %1748 = vmatprep.subr.bf16.mxu1 %v2790_v54 }
 0x252   :  { %1626 = vmatpush1.bf16.msra.mxu0 %v2785_v55  ;;  %1749 = vmatpush1.bf16.msra.mxu1 %v2788_v56 }
 0x253   :  { %1627 = vmatprep.subr.bf16.mxu0 %v2793_v57  ;;  %1750 = vmatprep.subr.bf16.mxu1 %v2796_v58 }
 0x256   :  { %1628 = vmatpush1.bf16.msra.mxu0 %v2791_v59  ;;  %1751 = vmatpush1.bf16.msra.mxu1 %v2794_v60 }
 0x257   :  { %1629 = vmatprep.subr.bf16.mxu0 %v2799_v61  ;;  %1752 = vmatprep.subr.bf16.mxu1 %v2802_v62 }
 0x25a   :  { %1630 = vmatpush1.bf16.msra.mxu0 %v2797_v63  ;;  %1753 = vmatpush1.bf16.msra.mxu1 %v2800_v0 }
 0x25b   :  { %1631 = vmatprep.subr.bf16.mxu0 %v2805_v1  ;;  %1754 = vmatprep.subr.bf16.mxu1 %v2808_v2 }
 0x25e   :  { %1632 = vmatpush1.bf16.msra.mxu0 %v2803_v3  ;;  %1755 = vmatpush1.bf16.msra.mxu1 %v2806_v31 }
 0x25f   :  { %2408 = vmatprep.subr.bf16.mxu0 %v2809_v5  ;;  %2430 = vmatprep.subr.bf16.mxu1 %v2810_v6 }
 0x261   :  { %1650 = vmatmul.mubr.bf16.vlgmr.msra.gmra.mrb[28].mxu0 %v552_v8  ;;  %1773 = vmatmul.mubr.bf16.vlgmr.msra.gmra.mrb[24].mxu1 %v552_v8 }
 0x262   :  { %2409 = vmatpush3.bf16.msra.mxu0 %v2811_v7  ;;  %2431 = vmatpush3.bf16.msra.mxu1 %v2812_v45  ;;  %v2345_v7 = vld [vmem:[%s3207_s8] ss:$0 sm:$0xff] }
 0x263   :  { %2410 = vmatprep.subr.bf16.mxu0 %v2813_v9  ;;  %2432 = vmatprep.subr.bf16.mxu1 %v2814_v10 }
 0x266   :  { %2411 = vmatpush3.bf16.msra.mxu0 %v2815_v11  ;;  %2433 = vmatpush3.bf16.msra.mxu1 %v2816_v12 }
 0x267   :  { %2412 = vmatprep.subr.bf16.mxu0 %v2817_v13  ;;  %2434 = vmatprep.subr.bf16.mxu1 %v2818_v14 }
 0x26a   :  { %2413 = vmatpush3.bf16.msra.mxu0 %v2819_v15  ;;  %2435 = vmatpush3.bf16.msra.mxu1 %v2820_v16 }
 0x26b   :  { %2414 = vmatprep.subr.bf16.mxu0 %v2821_v17  ;;  %2436 = vmatprep.subr.bf16.mxu1 %v2822_v18 }
 0x26e   :  { %2415 = vmatpush3.bf16.msra.mxu0 %v2823_v19  ;;  %2437 = vmatpush3.bf16.msra.mxu1 %v2824_v20 }
 0x26f   :  { %2416 = vmatprep.subr.bf16.mxu0 %v2825_v21  ;;  %2438 = vmatprep.subr.bf16.mxu1 %v2826_v22 }
 0x272   :  { %2417 = vmatpush3.bf16.msra.mxu0 %v2827_v23  ;;  %2439 = vmatpush3.bf16.msra.mxu1 %v2828_v24 }
 0x273   :  { %2418 = vmatprep.subr.bf16.mxu0 %v2829_v25  ;;  %2440 = vmatprep.subr.bf16.mxu1 %v2830_v27 }
 0x276   :  { %2419 = vmatpush3.bf16.msra.mxu0 %v2831_v28  ;;  %2441 = vmatpush3.bf16.msra.mxu1 %v2832_v29 }
 0x277   :  { %2420 = vmatprep.subr.bf16.mxu0 %v2833_v30  ;;  %2442 = vmatprep.subr.bf16.mxu1 %v2834_v32 }
 0x27a   :  { %2421 = vmatpush3.bf16.msra.mxu0 %v2835_v33  ;;  %2443 = vmatpush3.bf16.msra.mxu1 %v2836_v34 }
 0x27b   :  { %2422 = vmatprep.subr.bf16.mxu0 %v2837_v35  ;;  %2444 = vmatprep.subr.bf16.mxu1 %v2838_v36 }
 0x27e   :  { %2423 = vmatpush3.bf16.msra.mxu0 %v2839_v37  ;;  %2445 = vmatpush3.bf16.msra.mxu1 %v2840_v38 }
 0x334   :  { %v1651_v50 = vpop.f32.mrb[28].mxu0  ;;  %v1774_v51 = vpop.f32.mrb[24].mxu1 }
 0x335   :  { %v2530_v52 = vadd.f32 %v1651_v50, %v718_v46  ;;  %v2532_v53 = vadd.f32 %v1774_v51, %v726_v47  ;;  %v1653_v54 = vpop.f32.mrb[29].mxu0  ;;  %v1776_v55 = vpop.f32.mrb[25].mxu1 }
 0x336   :  { %v2531_v56 = vadd.f32 %v1653_v54, %v722_v48  ;;  %v2533_v57 = vadd.f32 %v1776_v55, %v730_v49  ;;  %v1655_v58 = vpop.f32.mrb[30].mxu0  ;;  %v1778_v59 = vpop.f32.mrb[26].mxu1 }
 0x337   :  { %v1781_v60 = vmax.f32 %v2530_v52, 0.0  ;;  %v1783_v61 = vmax.f32 %v2532_v53, 0.0  ;;  %v1656_v62 = vpop.f32.mrb[31].mxu0  ;;  %v1779_v63 = vpop.f32.mrb[27].mxu1 }
 0x338   :  { %v1782_v0 = vmax.f32 %v2531_v56, 0.0  ;;  %v1784_v1 = vmax.f32 %v2533_v57, 0.0 }
 0x339   :  { %v1785_v31 = vpack.c.bf16 %v1781_v60, %v1781_v60  ;;  %v1787_v4 = vpack.c.bf16 %v1783_v61, %v1783_v61 }
 0x33a   :  { %v1786_v2 = vpack.c.bf16 %v1782_v0, %v1782_v0  ;;  %v1788_v3 = vpack.c.bf16 %v1784_v1, %v1784_v1 }
 0x33c   :  { %2084 = vmatprep.mubr.bf16.mxu0 %v1786_v2  ;;  %2124 = vmatprep.mubr.bf16.mxu1 %v1788_v3 }
 0x33d   :  { %2085 = vmatmul.mubr.bf16.vlgmr.msra.gmra.mrb[32].mxu0 %v1785_v31  ;;  %2125 = vmatmul.mubr.bf16.vlgmr.msra.gmra.mrb[28].mxu1 %v1787_v4 }
 0x410   :  { %v2424_v5 = vpop.f32.mrb[32].mxu0  ;;  %v2446_v6 = vpop.f32.mrb[28].mxu1 }
 0x411   :  { %v2425_v45 = vpop.f32.mrb[33].mxu0  ;;  %v2447_v8 = vpop.f32.mrb[29].mxu1 }
 0x412   :  { %v2426_v9 = vadd.f32 %v2425_v45, %v2424_v5  ;;  %v2448_v10 = vadd.f32 %v2447_v8, %v2446_v6  ;;  %v2427_v11 = vpop.f32.mrb[34].mxu0  ;;  %v2449_v12 = vpop.f32.mrb[30].mxu1 }
 0x413   :  { %v2428_v13 = vpop.f32.mrb[35].mxu0  ;;  %v2450_v14 = vpop.f32.mrb[31].mxu1 }
 0x414   :  { %v2087_v15 = vadd.f32 %v2426_v9, %v2345_v7 }
 0x416   :  { %v2127_v16 = vadd.f32 %v2448_v10, %v2087_v15 }
 0x418   :  { %2132 = vst [vmem:[%s3208_s9] sm:$0xff] %v2127_v16 }
 0x419   :  { %2137 = vsyncpa [#allocation3], 1 }

</bundles_post_ra>
